<compile_context>
chip_gen: v5e
topology: v5e:2x2
jax: 0.10.0
libtpu: 0.0.40
codegen_flags: <defaults>
</compile_context>

<pallas_src>
import math

import jax
import jax.numpy as jnp
from jax.experimental import pallas as pl
from jax.experimental.pallas import tpu as pltpu

LANE = 128  # TPU lane width; all fused block widths are padded to this


def _pad_to(x, mult, axes):
    """Zero-pad `x` along `axes` up to the next multiple of `mult`."""
    pads = [(0, 0)] * x.ndim
    need = False
    for ax in axes:
        p = (-x.shape[ax]) % mult
        pads[ax] = (0, p)
        need = need or p > 0
    return jnp.pad(x, pads) if need else x


def make_rgn_kernel(num_relations):
    """All num_layers RelationalGraphLayer blocks fused into one kernel body."""
    E = num_relations

    def kernel(h_ref, adj_ref, maskb_ref, keep_ref, id_ref,
               w1_ref, b1_ref, w2_ref, b2_ref, wnh_ref, wna_ref, bn_ref,
               out_ref, h_scr):
        layer = pl.program_id(0)
        last = pl.num_programs(0) - 1

        @pl.when(layer == 0)
        def _():
            h_scr[...] = h_ref[...]

        h = h_scr[...]                                   # (N, Dp) f32
        h_b = h.astype(jnp.bfloat16)

        # ---- per-relation message MLP + aggregation, accumulated ----------
        # agg += A_e @ (ReLU(h @ W1_e + b1_e) @ W2_e + b2_e)
        agg = None
        for e in range(E):
            m1 = jnp.dot(h_b, w1_ref[e],
                         preferred_element_type=jnp.float32) + b1_ref[e]
            m1 = jnp.maximum(m1, 0.0)                    # (N, Hnp) f32
            m2 = jnp.dot(m1.astype(jnp.bfloat16), w2_ref[e],
                         preferred_element_type=jnp.float32) + b2_ref[e]
            contrib = jnp.dot(adj_ref[e], m2.astype(jnp.bfloat16),
                              preferred_element_type=jnp.float32)
            agg = contrib if agg is None else agg + contrib
        if agg is None:
            agg = jnp.zeros_like(h)

        # ---- fused per-node-type updater: ReLU(h @ Wh + agg @ Wa + b) -----
        upd = (jnp.dot(h_b, wnh_ref[...], preferred_element_type=jnp.float32)
               + jnp.dot(agg.astype(jnp.bfloat16), wna_ref[...],
                         preferred_element_type=jnp.float32)
               + bn_ref[...])
        upd = jnp.maximum(upd, 0.0)                      # (N, T*Dp) f32

        # one-hot select on VPU, then sum type blocks on the MXU (identity
        # stack); non-updated nodes keep their previous feature via `keep`.
        sel = upd * maskb_ref[...]
        new_h = h * keep_ref[...] + jnp.dot(
            sel, id_ref[...], preferred_element_type=jnp.float32)

        @pl.when(layer < last)
        def _():
            h_scr[...] = new_h

        @pl.when(layer == last)
        def _():
            out_ref[...] = new_h

    return kernel


def rgn_forward(h_pad, adj_sel, mask_bcast, keep_bcast, id_stack,
                w1, b1, w2, b2, wnh, wna, bn):
    """Run all layers in one pallas_call.

    h_pad      : (N, Dp)            f32 node features (lane-padded)
    adj_sel    : (E, N, N)          bf16, selected relations, A[e, dst, src]
    mask_bcast : (N, T*Dp)          f32 per-type select mask, pre-broadcast
    keep_bcast : (N, Dp)            f32 keep mask (1 - any selected type)
    id_stack   : (T*Dp, Dp)         f32 stacked identities (type-block sum)
    w1, b1     : (L, E, Dp, Hnp) bf16, (L, E, 1, Hnp) f32
    w2, b2     : (L, E, Hnp, Dp) bf16, (L, E, 1, Dp)  f32
    wnh, wna   : (L, Dp, T*Dp)   bf16 (h / agg halves of the updater)
    bn         : (L, 1, T*Dp)    f32
    """
    N, Dp = h_pad.shape
    L, E = w1.shape[0], w1.shape[1]
    Hnp = w1.shape[-1]
    TDp = wnh.shape[-1]

    kernel = make_rgn_kernel(E)

    def resident(shape):
        # full-array block whose index never changes -> DMA'd once, stays in VMEM
        nd = len(shape)
        return pl.BlockSpec(tuple(shape), lambda l, _n=nd: (0,) * _n)

    def per_layer(shape):
        # leading layer axis squeezed out, pipelined along the grid
        nz = len(shape) - 1
        return pl.BlockSpec((pl.Squeezed(),) + tuple(shape[1:]),
                            lambda l, _n=nz: (l,) + (0,) * _n)

    residents = (h_pad, adj_sel, mask_bcast, keep_bcast, id_stack)
    layer_stacks = (w1, b1, w2, b2, wnh, wna, bn)

    # ---- explicit VMEM budget (2x-buffered inputs + output + scratch) -----
    def nbytes(x):
        return x.size * x.dtype.itemsize

    resident_bytes = sum(nbytes(x) for x in residents)
    per_layer_bytes = sum(math.prod(x.shape[1:]) * x.dtype.itemsize
                          for x in layer_stacks)
    out_bytes = N * Dp * 4
    scratch_bytes = N * Dp * 4
    need = 2 * (resident_bytes + per_layer_bytes + out_bytes) + scratch_bytes
    vmem_limit = int(min(max(need + (8 << 20), 32 << 20), 112 << 20))

    # advisory scheduling hint for XLA around the custom call
    flops = 2 * L * (E * (N * Dp * Hnp + N * Hnp * Dp + N * N * Dp)
                     + 2 * N * Dp * TDp + N * TDp * Dp)
    bytes_accessed = int(resident_bytes + L * per_layer_bytes + out_bytes)

    grid_spec = pltpu.PrefetchScalarGridSpec(
        num_scalar_prefetch=0,
        grid=(L,),
        in_specs=[resident(x.shape) for x in residents]
                + [per_layer(x.shape) for x in layer_stacks],
        out_specs=pl.BlockSpec((N, Dp), lambda l: (0, 0)),
        scratch_shapes=[pltpu.VMEM((N, Dp), jnp.float32)],
    )

    return pl.pallas_call(
        kernel,
        out_shape=jax.ShapeDtypeStruct((N, Dp), jnp.float32),
        grid_spec=grid_spec,
        compiler_params=pltpu.CompilerParams(
            dimension_semantics=("arbitrary",),
            vmem_limit_bytes=vmem_limit),
        cost_estimate=pl.CostEstimate(
            flops=flops, transcendentals=0, bytes_accessed=bytes_accessed),
        input_output_aliases={0: 0},   # h_pad HBM buffer reused for the output
    )(h_pad, adj_sel, mask_bcast, keep_bcast, id_stack,
      w1, b1, w2, b2, wnh, wna, bn)


class RelationalGraphNetworkPallas:
    """Mirrors sc2rl RelationalGraphNetwork.forward on TPU via Pallas."""

    def __init__(self, num_layers, model_dim, num_relations, num_neurons,
                 spectral_norm, use_concat, use_multi_node_types,
                 node_update_types, edge_update_types, use_noisy=False,
                 key=jax.random.PRNGKey(0)):
        del spectral_norm, use_noisy  # disabled in this configuration
        assert use_multi_node_types   # per-node-type updater MLPs
        self.num_layers = num_layers
        self.model_dim = model_dim
        self.num_relations = num_relations
        self.num_neurons = num_neurons
        self.use_concat = use_concat
        self.node_update_types = list(node_update_types)
        self.edge_update_types = list(edge_update_types)

        D, Hn, R = model_dim, num_neurons, num_relations
        T = len(self.node_update_types)
        node_in = 2 * D if use_concat else D

        self.layer_params = []
        for _ in range(num_layers):
            key, k1, k2, k3 = jax.random.split(key, 4)
            w1 = 0.1 * jax.random.normal(k1, (R, D, Hn), jnp.float32)
            b1 = jnp.zeros((R, Hn), jnp.float32)
            w2 = 0.1 * jax.random.normal(k2, (R, Hn, D), jnp.float32)
            b2 = jnp.zeros((R, D), jnp.float32)
            wn = 0.1 * jax.random.normal(k3, (T, node_in, D), jnp.float32)
            bn = jnp.zeros((T, D), jnp.float32)
            self.layer_params.append((w1, b1, w2, b2, wn, bn))

    def _fuse_params(self, edge_idx, node_pos):
        """Per-relation / per-type weights, lane-padded to 128-wide blocks,
        weights in bf16, biases in f32, with a leading layer axis."""
        D, Hn = self.model_dim, self.num_neurons

        w1s, b1s, w2s, b2s, whs, was, bns = ([] for _ in range(7))
        for (w1, b1, w2, b2, wn, bn) in self.layer_params:
            w1e = jnp.stack([w1[r] for r in edge_idx], 0)             # (E, D, Hn)
            w1e = _pad_to(w1e, LANE, (1, 2)).astype(jnp.bfloat16)     # (E, Dp, Hnp)
            b1e = _pad_to(jnp.stack([b1[r] for r in edge_idx], 0),
                          LANE, (1,))[:, None, :]                     # (E, 1, Hnp)
            w2e = jnp.stack([w2[r] for r in edge_idx], 0)             # (E, Hn, D)
            w2e = _pad_to(w2e, LANE, (1, 2)).astype(jnp.bfloat16)     # (E, Hnp, Dp)
            b2e = _pad_to(jnp.stack([b2[r] for r in edge_idx], 0),
                          LANE, (1,))[:, None, :]                     # (E, 1, Dp)

            wh_blocks, wa_blocks, bn_blocks = [], [], []
            for p in node_pos:
                w = wn[p]                                             # (node_in, D)
                if self.use_concat:
                    wh_t, wa_t = w[:D], w[D:]                         # split h/agg
                else:
                    wh_t = wa_t = w                                   # (h+agg) @ W
                wh_blocks.append(_pad_to(wh_t, LANE, (0, 1)))         # (Dp, Dp)
                wa_blocks.append(_pad_to(wa_t, LANE, (0, 1)))
                bn_blocks.append(_pad_to(bn[p], LANE, (0,)))          # (Dp,)
            wh = jnp.concatenate(wh_blocks, -1).astype(jnp.bfloat16)  # (Dp, T*Dp)
            wa = jnp.concatenate(wa_blocks, -1).astype(jnp.bfloat16)
            bnc = jnp.concatenate(bn_blocks, -1)[None, :]             # (1, T*Dp)

            w1s.append(w1e); b1s.append(b1e); w2s.append(w2e); b2s.append(b2e)
            whs.append(wh); was.append(wa); bns.append(bnc)

        stack = lambda xs: jnp.stack(xs, axis=0)
        return tuple(map(stack, (w1s, b1s, w2s, b2s, whs, was, bns)))

    def __call__(self, adj, node_feature, node_type_onehot,
                 update_node_type_indices, update_edge_type_indices):
        D = self.model_dim
        Dp = -(-D // LANE) * LANE
        N = node_feature.shape[0]

        edge_idx = tuple(int(r) for r in update_edge_type_indices)
        node_idx = tuple(int(t) for t in update_node_type_indices
                         if t in self.node_update_types)
        node_pos = [self.node_update_types.index(t) for t in node_idx]
        T = len(node_idx)

        # selected relations, dense (E, N, N); {0,1} mask is exact in bf16
        adj_sel = jnp.stack([adj[r] for r in edge_idx], 0).astype(jnp.bfloat16)

        # layer-invariant node-type masks, built once in the wrapper
        mask_sel = node_type_onehot[:, jnp.array(node_idx)].astype(jnp.float32)
        mask_bcast = jnp.repeat(mask_sel, Dp, axis=1)                 # (N, T*Dp)
        keep = 1.0 - jnp.sum(mask_sel, axis=1, keepdims=True)         # (N, 1)
        keep_bcast = jnp.broadcast_to(keep, (N, Dp))                  # (N, Dp)
        id_stack = jnp.tile(jnp.eye(Dp, dtype=jnp.float32), (T, 1))   # (T*Dp, Dp)

        h_pad = _pad_to(node_feature.astype(jnp.float32), LANE, (1,)) # (N, Dp)

        params = self._fuse_params(edge_idx, node_pos)
        out_pad = rgn_forward(h_pad, adj_sel, mask_bcast, keep_bcast,
                              id_stack, *params)
        return out_pad[:, :D]


if __name__ == "__main__":
    # Small, deterministic example.
    NUM_LAYERS = 2
    MODEL_DIM = 32
    NUM_NEURONS = 32
    NUM_RELATIONS = 3
    NODE_TYPES = [0, 1]
    EDGE_TYPES = [0, 1, 2]
    N = 64  # number of graph nodes

    key = jax.random.PRNGKey(0)
    k_feat, k_adj, k_par = jax.random.split(key, 3)

    # Node features: (N, D)
    node_feature = jax.random.normal(k_feat, (N, MODEL_DIM), jnp.float32)

    # Dense per-relation adjacency (R, N, N), A[r, dst, src] in {0, 1}.
    adj = (jax.random.uniform(k_adj, (NUM_RELATIONS, N, N)) < 0.1
           ).astype(jnp.float32)

    # Node types: first half type 0, second half type 1 -> one-hot (N, T).
    node_type_ids = jnp.concatenate(
        [jnp.zeros((N // 2,), jnp.int32), jnp.ones((N - N // 2,), jnp.int32)])
    node_type_onehot = jax.nn.one_hot(
        node_type_ids, len(NODE_TYPES), dtype=jnp.float32)

    net = RelationalGraphNetworkPallas(
        num_layers=NUM_LAYERS,
        model_dim=MODEL_DIM,
        num_relations=NUM_RELATIONS,
        num_neurons=NUM_NEURONS,
        spectral_norm=False,
        use_concat=True,
        use_multi_node_types=True,
        node_update_types=NODE_TYPES,
        edge_update_types=EDGE_TYPES,
        use_noisy=False,
        key=k_par,
    )

    update_node_type_indices = [0, 1]
    update_edge_type_indices = [0, 2]

    out = net(adj, node_feature, node_type_onehot,
              update_node_type_indices, update_edge_type_indices)
    out = jax.block_until_ready(out)

    assert out.shape == (N, MODEL_DIM) and out.dtype == jnp.float32
    assert bool(jnp.all(jnp.isfinite(out)))
    print("KERNEL_OK")
</pallas_src>

<mosaic_0001>
module attributes {stable_mosaic.version = 11 : i64} {
  func.func @kernel(%arg0: i32, %arg1: memref<64x128xf32, #tpu.memory_space<vmem>>, %arg2: memref<2x64x64xbf16, #tpu.memory_space<vmem>>, %arg3: memref<64x256xf32, #tpu.memory_space<vmem>>, %arg4: memref<64x128xf32, #tpu.memory_space<vmem>>, %arg5: memref<256x128xf32, #tpu.memory_space<vmem>>, %arg6: memref<1x2x128x128xbf16, #tpu.memory_space<vmem>>, %arg7: memref<1x2x1x128xf32, #tpu.memory_space<vmem>>, %arg8: memref<1x2x128x128xbf16, #tpu.memory_space<vmem>>, %arg9: memref<1x2x1x128xf32, #tpu.memory_space<vmem>>, %arg10: memref<1x128x256xbf16, #tpu.memory_space<vmem>>, %arg11: memref<1x128x256xbf16, #tpu.memory_space<vmem>>, %arg12: memref<1x1x256xf32, #tpu.memory_space<vmem>>, %arg13: memref<64x128xf32, #tpu.memory_space<vmem>>, %arg14: memref<64x128xf32, #tpu.memory_space<vmem>>) attributes {dimension_semantics = [#tpu.dimension_semantics<arbitrary>], iteration_bounds = array<i64: 2>, scalar_prefetch = 0 : i64, scratch_operands = 1 : i64, tpu.core_type = #tpu.core_type<tc>, window_params = [{pipeline_mode = #tpu.pipeline_mode<synchronous>, transform_indices = @transform_0, window_bounds = array<i64: 64, 128>}, {pipeline_mode = #tpu.pipeline_mode<synchronous>, transform_indices = @transform_1, window_bounds = array<i64: 2, 64, 64>}, {pipeline_mode = #tpu.pipeline_mode<synchronous>, transform_indices = @transform_2, window_bounds = array<i64: 64, 256>}, {pipeline_mode = #tpu.pipeline_mode<synchronous>, transform_indices = @transform_3, window_bounds = array<i64: 64, 128>}, {pipeline_mode = #tpu.pipeline_mode<synchronous>, transform_indices = @transform_4, window_bounds = array<i64: 256, 128>}, {transform_indices = @transform_5, window_bounds = array<i64: 1, 2, 128, 128>}, {transform_indices = @transform_6, window_bounds = array<i64: 1, 2, 1, 128>}, {transform_indices = @transform_7, window_bounds = array<i64: 1, 2, 128, 128>}, {transform_indices = @transform_8, window_bounds = array<i64: 1, 2, 1, 128>}, {transform_indices = @transform_9, window_bounds = array<i64: 1, 128, 256>}, {transform_indices = @transform_10, window_bounds = array<i64: 1, 128, 256>}, {transform_indices = @transform_11, window_bounds = array<i64: 1, 1, 256>}, {pipeline_mode = #tpu.pipeline_mode<synchronous>, transform_indices = @transform_12, window_bounds = array<i64: 64, 128>}]} {
    %c0_i32 = arith.constant 0 : i32
    %0 = arith.cmpi eq, %arg0, %c0_i32 : i32
    %1 = arith.extui %0 : i1 to i32
    %c0_i32_0 = arith.constant 0 : i32
    %2 = arith.cmpi ne, %1, %c0_i32_0 : i32
    scf.if %2 {
      %c0_68 = arith.constant 0 : index
      %c0_69 = arith.constant 0 : index
      %75 = vector.load %arg1[%c0_68, %c0_69] : memref<64x128xf32, #tpu.memory_space<vmem>>, vector<64x128xf32>
      %c0_70 = arith.constant 0 : index
      %c0_71 = arith.constant 0 : index
      %76 = vector.load %arg14[%c0_70, %c0_71] : memref<64x128xf32, #tpu.memory_space<vmem>>, vector<64x128xf32>
      tpu.vector_store %arg14[%c0_70, %c0_71], %75 {strides = array<i32>} : memref<64x128xf32, #tpu.memory_space<vmem>>, vector<64x128xf32>,
    } else {
    }
    %c0 = arith.constant 0 : index
    %c0_1 = arith.constant 0 : index
    %3 = vector.load %arg14[%c0, %c0_1] : memref<64x128xf32, #tpu.memory_space<vmem>>, vector<64x128xf32>
    %4 = arith.truncf %3 : vector<64x128xf32> to vector<64x128xbf16>
    %c0_2 = arith.constant 0 : index
    %c0_3 = arith.constant 0 : index
    %c0_4 = arith.constant 0 : index
    %c0_5 = arith.constant 0 : index
    %5 = vector.load %arg6[%c0_2, %c0_3, %c0_4, %c0_5] : memref<1x2x128x128xbf16, #tpu.memory_space<vmem>>, vector<1x1x128x128xbf16>
    %6 = vector.shape_cast %5 : vector<1x1x128x128xbf16> to vector<128x128xbf16>
    %cst = arith.constant dense<0.000000e+00> : vector<64x128xf32>
    %7 = tpu.matmul %4, %6, %cst {dimension_numbers = #tpu.dot_dimension_numbers<[1], [0], [0], [1], [0, 0, 1, 1], [], []>} : vector<64x128xbf16>, vector<128x128xbf16>, vector<64x128xf32> -> vector<64x128xf32>
    %c0_6 = arith.constant 0 : index
    %c0_7 = arith.constant 0 : index
    %c0_8 = arith.constant 0 : index
    %c0_9 = arith.constant 0 : index
    %8 = vector.load %arg7[%c0_6, %c0_7, %c0_8, %c0_9] : memref<1x2x1x128xf32, #tpu.memory_space<vmem>>, vector<1x1x1x128xf32>
    %9 = vector.shape_cast %8 : vector<1x1x1x128xf32> to vector<1x128xf32>
    %10 = vector.broadcast %9 : vector<1x128xf32> to vector<64x128xf32>
    %11 = arith.addf %7, %10 : vector<64x128xf32>
    %cst_10 = arith.constant 0.000000e+00 : f32
    %12 = vector.broadcast %cst_10 : f32 to vector<64x128xf32>
    %13 = arith.maximumf %11, %12 : vector<64x128xf32>
    %14 = arith.truncf %13 : vector<64x128xf32> to vector<64x128xbf16>
    %c0_11 = arith.constant 0 : index
    %c0_12 = arith.constant 0 : index
    %c0_13 = arith.constant 0 : index
    %c0_14 = arith.constant 0 : index
    %15 = vector.load %arg8[%c0_11, %c0_12, %c0_13, %c0_14] : memref<1x2x128x128xbf16, #tpu.memory_space<vmem>>, vector<1x1x128x128xbf16>
    %16 = vector.shape_cast %15 : vector<1x1x128x128xbf16> to vector<128x128xbf16>
    %cst_15 = arith.constant dense<0.000000e+00> : vector<64x128xf32>
    %17 = tpu.matmul %14, %16, %cst_15 {dimension_numbers = #tpu.dot_dimension_numbers<[1], [0], [0], [1], [0, 0, 1, 1], [], []>} : vector<64x128xbf16>, vector<128x128xbf16>, vector<64x128xf32> -> vector<64x128xf32>
    %c0_16 = arith.constant 0 : index
    %c0_17 = arith.constant 0 : index
    %c0_18 = arith.constant 0 : index
    %c0_19 = arith.constant 0 : index
    %18 = vector.load %arg9[%c0_16, %c0_17, %c0_18, %c0_19] : memref<1x2x1x128xf32, #tpu.memory_space<vmem>>, vector<1x1x1x128xf32>
    %19 = vector.shape_cast %18 : vector<1x1x1x128xf32> to vector<1x128xf32>
    %20 = vector.broadcast %19 : vector<1x128xf32> to vector<64x128xf32>
    %21 = arith.addf %17, %20 : vector<64x128xf32>
    %c0_20 = arith.constant 0 : index
    %c0_21 = arith.constant 0 : index
    %c0_22 = arith.constant 0 : index
    %22 = vector.load %arg2[%c0_20, %c0_21, %c0_22] : memref<2x64x64xbf16, #tpu.memory_space<vmem>>, vector<1x64x64xbf16>
    %23 = vector.shape_cast %22 : vector<1x64x64xbf16> to vector<64x64xbf16>
    %24 = arith.truncf %21 : vector<64x128xf32> to vector<64x128xbf16>
    %cst_23 = arith.constant dense<0.000000e+00> : vector<64x128xf32>
    %25 = tpu.matmul %23, %24, %cst_23 {dimension_numbers = #tpu.dot_dimension_numbers<[1], [0], [0], [1], [0, 0, 1, 1], [], []>} : vector<64x64xbf16>, vector<64x128xbf16>, vector<64x128xf32> -> vector<64x128xf32>
    %c0_24 = arith.constant 0 : index
    %c1 = arith.constant 1 : index
    %c0_25 = arith.constant 0 : index
    %c0_26 = arith.constant 0 : index
    %26 = vector.load %arg6[%c0_24, %c1, %c0_25, %c0_26] : memref<1x2x128x128xbf16, #tpu.memory_space<vmem>>, vector<1x1x128x128xbf16>
    %27 = vector.shape_cast %26 : vector<1x1x128x128xbf16> to vector<128x128xbf16>
    %cst_27 = arith.constant dense<0.000000e+00> : vector<64x128xf32>
    %28 = tpu.matmul %4, %27, %cst_27 {dimension_numbers = #tpu.dot_dimension_numbers<[1], [0], [0], [1], [0, 0, 1, 1], [], []>} : vector<64x128xbf16>, vector<128x128xbf16>, vector<64x128xf32> -> vector<64x128xf32>
    %c0_28 = arith.constant 0 : index
    %c1_29 = arith.constant 1 : index
    %c0_30 = arith.constant 0 : index
    %c0_31 = arith.constant 0 : index
    %29 = vector.load %arg7[%c0_28, %c1_29, %c0_30, %c0_31] : memref<1x2x1x128xf32, #tpu.memory_space<vmem>>, vector<1x1x1x128xf32>
    %30 = vector.shape_cast %29 : vector<1x1x1x128xf32> to vector<1x128xf32>
    %31 = vector.broadcast %30 : vector<1x128xf32> to vector<64x128xf32>
    %32 = arith.addf %28, %31 : vector<64x128xf32>
    %cst_32 = arith.constant 0.000000e+00 : f32
    %33 = vector.broadcast %cst_32 : f32 to vector<64x128xf32>
    %34 = arith.maximumf %32, %33 : vector<64x128xf32>
    %35 = arith.truncf %34 : vector<64x128xf32> to vector<64x128xbf16>
    %c0_33 = arith.constant 0 : index
    %c1_34 = arith.constant 1 : index
    %c0_35 = arith.constant 0 : index
    %c0_36 = arith.constant 0 : index
    %36 = vector.load %arg8[%c0_33, %c1_34, %c0_35, %c0_36] : memref<1x2x128x128xbf16, #tpu.memory_space<vmem>>, vector<1x1x128x128xbf16>
    %37 = vector.shape_cast %36 : vector<1x1x128x128xbf16> to vector<128x128xbf16>
    %cst_37 = arith.constant dense<0.000000e+00> : vector<64x128xf32>
    %38 = tpu.matmul %35, %37, %cst_37 {dimension_numbers = #tpu.dot_dimension_numbers<[1], [0], [0], [1], [0, 0, 1, 1], [], []>} : vector<64x128xbf16>, vector<128x128xbf16>, vector<64x128xf32> -> vector<64x128xf32>
    %c0_38 = arith.constant 0 : index
    %c1_39 = arith.constant 1 : index
    %c0_40 = arith.constant 0 : index
    %c0_41 = arith.constant 0 : index
    %39 = vector.load %arg9[%c0_38, %c1_39, %c0_40, %c0_41] : memref<1x2x1x128xf32, #tpu.memory_space<vmem>>, vector<1x1x1x128xf32>
    %40 = vector.shape_cast %39 : vector<1x1x1x128xf32> to vector<1x128xf32>
    %41 = vector.broadcast %40 : vector<1x128xf32> to vector<64x128xf32>
    %42 = arith.addf %38, %41 : vector<64x128xf32>
    %c1_42 = arith.constant 1 : index
    %c0_43 = arith.constant 0 : index
    %c0_44 = arith.constant 0 : index
    %43 = vector.load %arg2[%c1_42, %c0_43, %c0_44] : memref<2x64x64xbf16, #tpu.memory_space<vmem>>, vector<1x64x64xbf16>
    %44 = vector.shape_cast %43 : vector<1x64x64xbf16> to vector<64x64xbf16>
    %45 = arith.truncf %42 : vector<64x128xf32> to vector<64x128xbf16>
    %cst_45 = arith.constant dense<0.000000e+00> : vector<64x128xf32>
    %46 = tpu.matmul %44, %45, %cst_45 {dimension_numbers = #tpu.dot_dimension_numbers<[1], [0], [0], [1], [0, 0, 1, 1], [], []>} : vector<64x64xbf16>, vector<64x128xbf16>, vector<64x128xf32> -> vector<64x128xf32>
    %47 = arith.addf %25, %46 : vector<64x128xf32>
    %c0_46 = arith.constant 0 : index
    %c0_47 = arith.constant 0 : index
    %c0_48 = arith.constant 0 : index
    %48 = vector.load %arg10[%c0_46, %c0_47, %c0_48] : memref<1x128x256xbf16, #tpu.memory_space<vmem>>, vector<1x128x256xbf16>
    %49 = vector.shape_cast %48 : vector<1x128x256xbf16> to vector<128x256xbf16>
    %cst_49 = arith.constant dense<0.000000e+00> : vector<64x256xf32>
    %50 = tpu.matmul %4, %49, %cst_49 {dimension_numbers = #tpu.dot_dimension_numbers<[1], [0], [0], [1], [0, 0, 1, 1], [], []>} : vector<64x128xbf16>, vector<128x256xbf16>, vector<64x256xf32> -> vector<64x256xf32>
    %51 = arith.truncf %47 : vector<64x128xf32> to vector<64x128xbf16>
    %c0_50 = arith.constant 0 : index
    %c0_51 = arith.constant 0 : index
    %c0_52 = arith.constant 0 : index
    %52 = vector.load %arg11[%c0_50, %c0_51, %c0_52] : memref<1x128x256xbf16, #tpu.memory_space<vmem>>, vector<1x128x256xbf16>
    %53 = vector.shape_cast %52 : vector<1x128x256xbf16> to vector<128x256xbf16>
    %cst_53 = arith.constant dense<0.000000e+00> : vector<64x256xf32>
    %54 = tpu.matmul %51, %53, %cst_53 {dimension_numbers = #tpu.dot_dimension_numbers<[1], [0], [0], [1], [0, 0, 1, 1], [], []>} : vector<64x128xbf16>, vector<128x256xbf16>, vector<64x256xf32> -> vector<64x256xf32>
    %55 = arith.addf %50, %54 : vector<64x256xf32>
    %c0_54 = arith.constant 0 : index
    %c0_55 = arith.constant 0 : index
    %c0_56 = arith.constant 0 : index
    %56 = vector.load %arg12[%c0_54, %c0_55, %c0_56] : memref<1x1x256xf32, #tpu.memory_space<vmem>>, vector<1x1x256xf32>
    %57 = vector.shape_cast %56 : vector<1x1x256xf32> to vector<1x256xf32>
    %58 = vector.broadcast %57 : vector<1x256xf32> to vector<64x256xf32>
    %59 = arith.addf %55, %58 : vector<64x256xf32>
    %cst_57 = arith.constant 0.000000e+00 : f32
    %60 = vector.broadcast %cst_57 : f32 to vector<64x256xf32>
    %61 = arith.maximumf %59, %60 : vector<64x256xf32>
    %c0_58 = arith.constant 0 : index
    %c0_59 = arith.constant 0 : index
    %62 = vector.load %arg3[%c0_58, %c0_59] : memref<64x256xf32, #tpu.memory_space<vmem>>, vector<64x256xf32>
    %63 = arith.mulf %61, %62 : vector<64x256xf32>
    %c0_60 = arith.constant 0 : index
    %c0_61 = arith.constant 0 : index
    %64 = vector.load %arg4[%c0_60, %c0_61] : memref<64x128xf32, #tpu.memory_space<vmem>>, vector<64x128xf32>
    %65 = arith.mulf %3, %64 : vector<64x128xf32>
    %c0_62 = arith.constant 0 : index
    %c0_63 = arith.constant 0 : index
    %66 = vector.load %arg5[%c0_62, %c0_63] : memref<256x128xf32, #tpu.memory_space<vmem>>, vector<256x128xf32>
    %cst_64 = arith.constant dense<0.000000e+00> : vector<64x128xf32>
    %67 = tpu.matmul %63, %66, %cst_64 {dimension_numbers = #tpu.dot_dimension_numbers<[1], [0], [0], [1], [0, 0, 1, 1], [], []>} : vector<64x256xf32>, vector<256x128xf32>, vector<64x128xf32> -> vector<64x128xf32>
    %68 = arith.addf %65, %67 : vector<64x128xf32>
    %c1_i32 = arith.constant 1 : i32
    %69 = arith.cmpi slt, %arg0, %c1_i32 : i32
    %70 = arith.extui %69 : i1 to i32
    %c0_i32_65 = arith.constant 0 : i32
    %71 = arith.cmpi ne, %70, %c0_i32_65 : i32
    scf.if %71 {
      %c0_68 = arith.constant 0 : index
      %c0_69 = arith.constant 0 : index
      %75 = vector.load %arg14[%c0_68, %c0_69] : memref<64x128xf32, #tpu.memory_space<vmem>>, vector<64x128xf32>
      tpu.vector_store %arg14[%c0_68, %c0_69], %68 {strides = array<i32>} : memref<64x128xf32, #tpu.memory_space<vmem>>, vector<64x128xf32>,
    } else {
    }
    %c1_i32_66 = arith.constant 1 : i32
    %72 = arith.cmpi eq, %arg0, %c1_i32_66 : i32
    %73 = arith.extui %72 : i1 to i32
    %c0_i32_67 = arith.constant 0 : i32
    %74 = arith.cmpi ne, %73, %c0_i32_67 : i32
    scf.if %74 {
      %c0_68 = arith.constant 0 : index
      %c0_69 = arith.constant 0 : index
      %75 = vector.load %arg13[%c0_68, %c0_69] : memref<64x128xf32, #tpu.memory_space<vmem>>, vector<64x128xf32>
      tpu.vector_store %arg13[%c0_68, %c0_69], %68 {strides = array<i32>} : memref<64x128xf32, #tpu.memory_space<vmem>>, vector<64x128xf32>,
    } else {
    }
    return
  }
  func.func @transform_0(%arg0: i32) -> (i32, i32) {
    %c0_i32 = arith.constant 0 : i32
    %c0_i32_0 = arith.constant 0 : i32
    %c0_i32_1 = arith.constant 0 : i32
    return %c0_i32, %c0_i32_0 : i32, i32
  }
  func.func @transform_1(%arg0: i32) -> (i32, i32, i32) {
    %c0_i32 = arith.constant 0 : i32
    %c0_i32_0 = arith.constant 0 : i32
    %c0_i32_1 = arith.constant 0 : i32
    %c0_i32_2 = arith.constant 0 : i32
    return %c0_i32, %c0_i32_0, %c0_i32_1 : i32, i32, i32
  }
  func.func @transform_2(%arg0: i32) -> (i32, i32) {
    %c0_i32 = arith.constant 0 : i32
    %c0_i32_0 = arith.constant 0 : i32
    %c0_i32_1 = arith.constant 0 : i32
    return %c0_i32, %c0_i32_0 : i32, i32
  }
  func.func @transform_3(%arg0: i32) -> (i32, i32) {
    %c0_i32 = arith.constant 0 : i32
    %c0_i32_0 = arith.constant 0 : i32
    %c0_i32_1 = arith.constant 0 : i32
    return %c0_i32, %c0_i32_0 : i32, i32
  }
  func.func @transform_4(%arg0: i32) -> (i32, i32) {
    %c0_i32 = arith.constant 0 : i32
    %c0_i32_0 = arith.constant 0 : i32
    %c0_i32_1 = arith.constant 0 : i32
    return %c0_i32, %c0_i32_0 : i32, i32
  }
  func.func @transform_5(%arg0: i32) -> (i32, i32, i32, i32) {
    %c0_i32 = arith.constant 0 : i32
    %c0_i32_0 = arith.constant 0 : i32
    %c0_i32_1 = arith.constant 0 : i32
    %c0_i32_2 = arith.constant 0 : i32
    return %arg0, %c0_i32, %c0_i32_0, %c0_i32_1 : i32, i32, i32, i32
  }
  func.func @transform_6(%arg0: i32) -> (i32, i32, i32, i32) {
    %c0_i32 = arith.constant 0 : i32
    %c0_i32_0 = arith.constant 0 : i32
    %c0_i32_1 = arith.constant 0 : i32
    %c0_i32_2 = arith.constant 0 : i32
    return %arg0, %c0_i32, %c0_i32_0, %c0_i32_1 : i32, i32, i32, i32
  }
  func.func @transform_7(%arg0: i32) -> (i32, i32, i32, i32) {
    %c0_i32 = arith.constant 0 : i32
    %c0_i32_0 = arith.constant 0 : i32
    %c0_i32_1 = arith.constant 0 : i32
    %c0_i32_2 = arith.constant 0 : i32
    return %arg0, %c0_i32, %c0_i32_0, %c0_i32_1 : i32, i32, i32, i32
  }
  func.func @transform_8(%arg0: i32) -> (i32, i32, i32, i32) {
    %c0_i32 = arith.constant 0 : i32
    %c0_i32_0 = arith.constant 0 : i32
    %c0_i32_1 = arith.constant 0 : i32
    %c0_i32_2 = arith.constant 0 : i32
    return %arg0, %c0_i32, %c0_i32_0, %c0_i32_1 : i32, i32, i32, i32
  }
  func.func @transform_9(%arg0: i32) -> (i32, i32, i32) {
    %c0_i32 = arith.constant 0 : i32
    %c0_i32_0 = arith.constant 0 : i32
    %c0_i32_1 = arith.constant 0 : i32
    return %arg0, %c0_i32, %c0_i32_0 : i32, i32, i32
  }
  func.func @transform_10(%arg0: i32) -> (i32, i32, i32) {
    %c0_i32 = arith.constant 0 : i32
    %c0_i32_0 = arith.constant 0 : i32
    %c0_i32_1 = arith.constant 0 : i32
    return %arg0, %c0_i32, %c0_i32_0 : i32, i32, i32
  }
  func.func @transform_11(%arg0: i32) -> (i32, i32, i32) {
    %c0_i32 = arith.constant 0 : i32
    %c0_i32_0 = arith.constant 0 : i32
    %c0_i32_1 = arith.constant 0 : i32
    return %arg0, %c0_i32, %c0_i32_0 : i32, i32, i32
  }
  func.func @transform_12(%arg0: i32) -> (i32, i32) {
    %c0_i32 = arith.constant 0 : i32
    %c0_i32_0 = arith.constant 0 : i32
    %c0_i32_1 = arith.constant 0 : i32
    return %c0_i32, %c0_i32_0 : i32, i32
  }
}

</mosaic_0001>

<bundles_post_ra>
// kernel: tpu_custom_call.1
= control target key start
LH: loop header
LB: loop body
LE: loop exit
PB: predicated region body
PF: predicated region fallthrough
CT: control target
= control target key end

     0   :  { %s3508_s0 = inlined_call_operand.hbm [shape: f32[64,128], index: 0, kind: input, shape index: {}, may-alias: {0,12}]   ;;  %s3509_s1 = inlined_call_operand.hbm [shape: bf16[2,64,64], index: 1, kind: input, shape index: {}]   ;;  %s3510_s2 = inlined_call_operand.vmem [shape: f32[64,256], index: 2, kind: input, shape index: {}]   ;;  %s3511_s3 = inlined_call_operand.hbm [shape: f32[64,128], index: 3, kind: input, shape index: {}]   ;;  %s3512_s4 = inlined_call_operand.hbm [shape: f32[256,128], index: 4, kind: input, shape index: {}]   ;;  %s3513_s5 = inlined_call_operand.hbm [shape: bf16[2,2,128,128], index: 5, kind: input, shape index: {}]   ;;  %s3514_s6 = inlined_call_operand.vmem [shape: f32[2,2,1,128], index: 6, kind: input, shape index: {}]   ;;  %s3515_s7 = inlined_call_operand.hbm [shape: bf16[2,2,128,128], index: 7, kind: input, shape index: {}]   ;;  %s3516_s8 = inlined_call_operand.hbm [shape: f32[2,2,1,128], index: 8, kind: input, shape index: {}]   ;;  %s3517_s9 = inlined_call_operand.hbm [shape: bf16[2,128,256], index: 9, kind: input, shape index: {}]   ;;  %s3518_s10 = inlined_call_operand.hbm [shape: bf16[2,128,256], index: 10, kind: input, shape index: {}]   ;;  %s3519_s11 = inlined_call_operand.vmem [shape: f32[2,1,256], index: 11, kind: input, shape index: {}]   ;;  %s3520_s12 = inlined_call_operand.hbm [shape: f32[64,128], index: 12, kind: output, shape index: {}, may-alias: {0,12}]  }
   0x1   :  { %3533 = sst [smem:[#allocation26_spill]] %s3508_s0 }
   0x2   :  { %3534 = sst [smem:[#allocation27_spill]] %s3510_s2 }
   0x3   :  { %3535 = sst [smem:[#allocation28_spill]] %s3513_s5 }
   0x4   :  { %3536 = sst [smem:[#allocation29_spill]] %s3514_s6 }
   0x5   :  { %3537 = sst [smem:[#allocation30_spill]] %s3515_s7 }
   0x6   :  { %3538 = sst [smem:[#allocation31_spill]] %s3519_s11 }
   0x7   :  { %3539 = sst [smem:[#allocation32_spill]] %s3520_s12 }
   0x8   :  { %17 = vsyncpa [#allocation4], 0 }
   0x9   :  { %18 = vsyncpa [#allocation7], 0 }
   0xa   :  { %19 = vsyncpa [#allocation10], 0 }
   0xb   :  { %20 = vsyncpa [#allocation5], 0  ;;  %s3020_s21 = smov 0   ;;  %s3022_s22 = smov 0  }
   0xc   :  { %s3024_s23 = smov 0   ;;  %s3026_s24 = smov 0  }
   0xd LB: > { %3540 = sst [smem:[#allocation22_spill]] %s2932_s22  ;;  %s3039_s25 = sadd.s32 4294967295, %s2940_s24   ;;  %s2940_s24 = sphi %s3026_s24, %s3564_s24   ;;  %s2936_s23 = sphi %s3024_s23, %s3568_s23   ;;  %s2932_s22 = sphi %s3022_s22, %s3567_s22   ;;  %s2928_s21 = sphi %s3020_s21, %s3565_s21  }
   0xe   : > { %s3042_s26 = sadd.s32 1, %s2940_s24   ;;  %s138_s28 = sadd.s32 1, %s2936_s23 }
   0xf   : > { %3541 = sst [smem:[#allocation23_spill]] %s3042_s26  ;;  %s135_s27 = ssub.s32 %s2940_s24, %s3042_s26 }
  0x10   : > { %p136_p0 = scmp.eq.s32.totalorder %s135_s27, 0  ;;  %p145_p1 = scmp.ne.s32.totalorder %s2936_s23, %s2932_s22 }
  0x11   : > { %p146_p2 = scmp.eq.s32.totalorder %s2940_s24, 0  ;;  %p151_p3 = scmp.ne.s32.totalorder %s2932_s22, %s2928_s21 }
  0x12   : > { %s3052_s29 = scalar_select %p136_p0, %s2936_s23, %s138_s28  }
  0x13   : > { %p3054_p4 = por %p146_p2, %p145_p1  ;;  %p152_p5 = scmp.eq.s32.totalorder %s3039_s25, 0 }
  0x14   : > { %3542 = sst [smem:[#allocation24_spill]] %s3052_s29  ;;  %p2020_p6 = scmp.ge.s32.totalorder %s2940_s24, 1 }
  0x15   : > { %p339_p7 = scmp.lt.s32.totalorder %s2940_s24, 3  ;;  %p3063_p8 = por %p152_p5, %p151_p3 }
  0x16   : > { %p2021_p9 = scmp.ne.s32.totalorder %s3039_s25, 0  ;;  %s3547_s0 = sld [smem:[#allocation26_spill]] }
  0x17   : > { %s3544_s13 = scalar_select %p3063_p8, 1, 0 }
  0x18   : > { %p3068_p10 = pnand %p2020_p6, %p339_p7  ;;  %s2942_s18 = smov [#allocation3]  }
  0x19   : > { %3545 = sst [smem:[#allocation25_spill]] %s3544_s13  ;;  %s352_s19 = sshll.u32 %s2942_s18, 4  ;;  %s353_s19 = int_to_ptr.vmem [resolvable:$true] %s352_s19 }
  0x1a   : > { %p2495_p11 = pneg %p3068_p10  ;;  %s3523_s21 = smov 128  }
  0x1b   : > { %s3525_s27 = smov 8   ;;  %p2528_p13 = scmp.lt.s32.totalorder %s2940_s24, 2 }
  0x1c   : > { %s350_s17 = sshll.u32 %s3547_s0, 4  ;;  %p3079_p12 = pnand %p2495_p11, %p152_p5  ;;  %s351_s17 = int_to_ptr.hbm [resolvable:$true] %s350_s17 }
  0x1d   : > { %s411_s28 = sand.u32 1, %s2940_s24   ;;  %s3527_s15 = sand.u32 1, %s2936_s23  }
  0x1e   : > { %2498 = dma.hbm_to_vmem [thread:$0]  (!%p3079_p12), %s351_s17, 1024, %s353_s19, [#allocation4], %s3523_s21, %s3523_s21, %s3525_s27  }
  0x1f   : > { %s3093_s16 = sshll.u32 %s3527_s15, 7  ;;  %s3096_s18 = sshll.u32 %s2940_s24, 7 }
  0x20   : > { %s3549_s5 = sld [smem:[#allocation28_spill]]  ;;  %s415_s17 = scalar_lea.vmem [#allocation11], %s3093_s16 }
  0x21   : > { %s3105_s19 = sshll.u32 %s415_s17, 4  ;;  %p3111_p0 = pnand %p2528_p13, %p3054_p4  ;;  %s424_s19 = int_to_ptr.vmem [resolvable:$true] %s3105_s19 }
  0x22   : > { %s3551_s7 = sld [smem:[#allocation30_spill]]  ;;  %s444_s29 = scalar_lea.vmem [#allocation12], %s3093_s16 }
  0x23   : > { %s3124_s17 = scalar_lea.sflag [#allocation4], %s411_s28  ;;  %p3128_p2 = pneg %p3111_p0 }
  0x26   : > { %s420_s26 = scalar_lea.hbm %s3549_s5, %s3096_s18 }
  0x27   : > { %s3102_s12 = sshll.u32 %s420_s26, 4  ;;  %s3120_s26 = sshll.u32 %s444_s29, 4  ;;  %s422_s12 = int_to_ptr.hbm [resolvable:$true] %s3102_s12  ;;  %s453_s26 = int_to_ptr.vmem [resolvable:$true] %s3120_s26 }
  0x28   : > { %s449_s0 = scalar_lea.hbm %s3551_s7, %s3096_s18  ;;  %s2622_s11 = sshra.s32 %s422_s12, 4  ;;  %s2623_s11 = int_to_ptr.hbm [resolvable:$true] %s2622_s11 }
  0x29   : > { %s3122_s2 = sshll.u32 %s449_s0, 4  ;;  %s2624_s6 = scalar_lea.hbm %s2623_s11, 128  ;;  %s451_s2 = int_to_ptr.hbm [resolvable:$true] %s3122_s2 }
  0x2a   : > { %p2625_p1 = scmp.ne.s32.totalorder %s2623_s11, %s2624_s6  ;;  %s2629_s0 = scalar_lea.hbm %s3549_s5, 256 }
  0x2b   : > { %p2630_p6 = scmp.lt.s32.totalorder %s2623_s11, %s3549_s5  ;;  %p2631_p7 = scmp.lt.s32.totalorder %s2629_s0, %s2624_s6 }
  0x2c   : > { %p2627_p3 = pnand %p3128_p2, %p2625_p1 }
  0x2d   : > { %p2632_p11 = por %p2631_p7, %p2630_p6 }
  0x2e   : > { %p2628_p4 = pneg %p2627_p3 }
  0x30   : > { %p2633_p13 = pnand %p2632_p11, %p2628_p4 }
  0x32   : > { %2636 = shalt.err (!%p2633_p13)
}
  0x33   : > { %s3532_s13 = smov 64   ;;  %s2946_s22 = smov 4  }
  0x34   : > { %2511 = dma.hbm_to_vmem [thread:$0]  (!%p3111_p0), %s422_s12, 2048, %s424_s19, %s3124_s17, %s3532_s13, %s3532_s13, %s2946_s22  }
  0x35   : > { %s2652_s27 = sshra.s32 %s451_s2, 4  ;;  %s2659_s0 = scalar_lea.hbm %s3551_s7, 256  ;;  %s2653_s27 = int_to_ptr.hbm [resolvable:$true] %s2652_s27 }
  0x36   : > { %s2654_s6 = scalar_lea.hbm %s2653_s27, 128  ;;  %p2660_p6 = scmp.lt.s32.totalorder %s2653_s27, %s3551_s7 }
  0x37   : > { %p2655_p1 = scmp.ne.s32.totalorder %s2653_s27, %s2654_s6  ;;  %p2661_p7 = scmp.lt.s32.totalorder %s2659_s0, %s2654_s6 }
  0x39   : > { %p2657_p3 = pnand %p2655_p1, %p3128_p2  ;;  %p2662_p11 = por %p2661_p7, %p2660_p6 }
  0x3b   : > { %p2658_p4 = pneg %p2657_p3 }
  0x3d   : > { %p2663_p13 = pnand %p2662_p11, %p2658_p4 }
  0x3f   : > { %2666 = shalt.err (!%p2663_p13)
}
  0x40   : > { %2514 = dma.hbm_to_vmem [thread:$0]  (!%p3111_p0), %s451_s2, 2048, %s453_s26, %s3124_s17, %s3532_s13, %s3532_s13, %s2946_s22  }
  0x41   : > { %s3553_s12 = sand.u32 1, %s2936_s23   ;;  %s2033_s11 = sshll.u32 %s2940_s24, 1 }
  0x42   : > { %s2032_s19 = sshll.u32 %s3553_s12, 1  ;;  %s470_s27 = scalar_lea.hbm %s3516_s8, %s2033_s11 }
  0x43   : > { %s471_s6 = sshll.u32 %s470_s27, 4  ;;  %s466_s0 = scalar_lea.vmem [#allocation13], %s2032_s19  ;;  %s472_s6 = int_to_ptr.hbm [resolvable:$true] %s471_s6 }
  0x44   : > { %s473_s28 = sshll.u32 %s466_s0, 4  ;;  %s2682_s5 = sshra.s32 %s472_s6, 4  ;;  %s474_s28 = int_to_ptr.vmem [resolvable:$true] %s473_s28  ;;  %s2683_s5 = int_to_ptr.hbm [resolvable:$true] %s2682_s5 }
  0x45   : > { %s2684_s7 = scalar_lea.hbm %s2683_s5, 2  ;;  %s2689_s24 = scalar_lea.hbm %s3516_s8, 4 }
  0x46   : > { %p2685_p1 = scmp.ne.s32.totalorder %s2683_s5, %s2684_s7  ;;  %p2690_p6 = scmp.lt.s32.totalorder %s2683_s5, %s3516_s8 }
  0x47   : > { %p2691_p7 = scmp.lt.s32.totalorder %s2689_s24, %s2684_s7 }
  0x48   : > { %p2687_p3 = pnand %p2685_p1, %p3128_p2 }
  0x49   : > { %p2692_p11 = por %p2691_p7, %p2690_p6 }
  0x4a   : > { %p2688_p4 = pneg %p2687_p3 }
  0x4c   : > { %p2693_p13 = pnand %p2692_p11, %p2688_p4 }
  0x4e   : > { %2696 = shalt.err (!%p2693_p13)
}
  0x4f   : > { %s2947_s19 = smov 16   ;;  %s2948_s11 = smov 1  }
  0x50   : > { %2517 = dma.hbm_to_vmem [thread:$0]  (!%p3111_p0), %s472_s6, 32, %s474_s28, %s3124_s17, %s2947_s19, %s2947_s19, %s2948_s11  }
  0x51   : > { %s364_s27 = sshll.u32 %s3509_s1, 4  ;;  %s2949_s5 = smov [#allocation6]   ;;  %s365_s27 = int_to_ptr.hbm [resolvable:$true] %s364_s27 }
  0x52   : > { %s366_s7 = sshll.u32 %s2949_s5, 4  ;;  %s3554_s13 = smov 64   ;;  %s367_s7 = int_to_ptr.vmem [resolvable:$true] %s366_s7 }
  0x53   : > { %2501 = dma.hbm_to_vmem [thread:$0]  (!%p3079_p12), %s365_s27, 1024, %s367_s7, [#allocation7], %s3554_s13, %s3554_s13, %s2946_s22  }
  0x54   : > { %s492_s26 = scalar_lea.hbm %s3517_s9, %s3096_s18  ;;  %s487_s24 = scalar_lea.vmem [#allocation14], %s3093_s16 }
  0x55   : > { %s495_s6 = sshll.u32 %s487_s24, 4  ;;  %s493_s28 = sshll.u32 %s492_s26, 4  ;;  %s496_s6 = int_to_ptr.vmem [resolvable:$true] %s495_s6  ;;  %s494_s28 = int_to_ptr.hbm [resolvable:$true] %s493_s28 }
  0x56   : > { %s381_s11 = sshll.u32 %s3511_s3, 4  ;;  %s2742_s15 = sshra.s32 %s494_s28, 4  ;;  %s2743_s15 = int_to_ptr.hbm [resolvable:$true] %s2742_s15  ;;  %s382_s11 = int_to_ptr.hbm [resolvable:$true] %s381_s11 }
  0x57   : > { %s2744_s29 = scalar_lea.hbm %s2743_s15, 128  ;;  %s2749_s5 = scalar_lea.hbm %s3517_s9, 256 }
  0x58   : > { %p2745_p1 = scmp.ne.s32.totalorder %s2743_s15, %s2744_s29  ;;  %p2750_p6 = scmp.lt.s32.totalorder %s2743_s15, %s3517_s9 }
  0x59   : > { %p2751_p7 = scmp.lt.s32.totalorder %s2749_s5, %s2744_s29 }
  0x5a   : > { %p2747_p3 = pnand %p2745_p1, %p3128_p2 }
  0x5b   : > { %p2752_p11 = por %p2751_p7, %p2750_p6 }
  0x5c   : > { %p2748_p4 = pneg %p2747_p3 }
  0x5e   : > { %p2753_p13 = pnand %p2752_p11, %p2748_p4 }
  0x60   : > { %2756 = shalt.err (!%p2753_p13)
}
  0x61   : > { %s3555_s0 = smov 8   ;;  %s3556_s2 = smov 128  }
  0x62   : > { %2520 = dma.hbm_to_vmem [thread:$0]  (!%p3111_p0), %s494_s28, 2048, %s496_s6, %s3124_s17, %s3556_s2, %s3556_s2, %s3555_s0  }
  0x63   : > { %s2950_s26 = smov [#allocation8]   ;;  %s395_s15 = sshll.u32 %s3512_s4, 4  ;;  %s396_s15 = int_to_ptr.hbm [resolvable:$true] %s395_s15 }
  0x64   : > { %s383_s24 = sshll.u32 %s2950_s26, 4  ;;  %s2951_s29 = smov [#allocation9]   ;;  %s384_s24 = int_to_ptr.vmem [resolvable:$true] %s383_s24 }
  0x65   : > { %2504 = dma.hbm_to_vmem [thread:$0]  (!%p3079_p12), %s382_s11, 1024, %s384_s24, [#allocation7], %s3556_s2, %s3556_s2, %s3555_s0  }
  0x66   : > { %s397_s22 = sshll.u32 %s2951_s29, 4  ;;  %s514_s6 = scalar_lea.hbm %s3518_s10, %s3096_s18  ;;  %s398_s22 = int_to_ptr.vmem [resolvable:$true] %s397_s22 }
  0x67   : > { %s515_s28 = sshll.u32 %s514_s6, 4  ;;  %s509_s7 = scalar_lea.vmem [#allocation15], %s3093_s16  ;;  %s516_s28 = int_to_ptr.hbm [resolvable:$true] %s515_s28 }
  0x68   : > { %2507 = dma.hbm_to_vmem [thread:$0]  (!%p3079_p12), %s396_s15, 4096, %s398_s22, [#allocation10], %s3556_s2, %s3556_s2, %s3555_s0  }
  0x69   : > { %s517_s13 = sshll.u32 %s509_s7, 4  ;;  %s2832_s26 = sshra.s32 %s516_s28, 4  ;;  %s518_s13 = int_to_ptr.vmem [resolvable:$true] %s517_s13  ;;  %s2833_s26 = int_to_ptr.hbm [resolvable:$true] %s2832_s26 }
  0x6a   : > { %s2834_s11 = scalar_lea.hbm %s2833_s26, 128  ;;  %s2839_s12 = scalar_lea.hbm %s3518_s10, 256 }
  0x6b   : > { %p2835_p1 = scmp.ne.s32.totalorder %s2833_s26, %s2834_s11  ;;  %p2840_p6 = scmp.lt.s32.totalorder %s2833_s26, %s3518_s10 }
  0x6c   : > { %p2841_p12 = scmp.lt.s32.totalorder %s2839_s12, %s2834_s11 }
  0x6d   : > { %p2837_p3 = pnand %p2835_p1, %p3128_p2 }
  0x6e   : > { %p2842_p7 = por %p2841_p12, %p2840_p6 }
  0x6f   : > { %p2838_p4 = pneg %p2837_p3 }
  0x71   : > { %p2843_p11 = pnand %p2842_p7, %p2838_p4 }
  0x73   : > { %2846 = shalt.err (!%p2843_p11)
}
  0x74   : > { %2523 = dma.hbm_to_vmem [thread:$0]  (!%p3111_p0), %s516_s28, 2048, %s518_s13, %s3124_s17, %s3556_s2, %s3556_s2, %s3555_s0  }
  0x75   : > { %536 = sbr.rel (%p3068_p10) target bundleno = 1045 (0x415), region = 68 }
  0x7a   : > { %2907 = dma.done.wait (%p152_p5), [#allocation4], 1024  }
  0x7b   : > { %2909 = vsyncadd (%p152_p5), [#allocation4], 4294966272 }
  0x7c   : > { %2911 = dma.done.wait (%p152_p5), [#allocation7], 2048  }
  0x7d   : > { %2913 = vsyncadd (%p152_p5), [#allocation7], 4294965248 }
  0x7e   : > { %2915 = dma.done.wait (%p152_p5), [#allocation10], 4096  }
  0x7f   : > { %2917 = vsyncadd (%p152_p5), [#allocation10], 4294963200  ;;  %s3557_s14 = sld [smem:[#allocation22_spill]]  ;;  %s558_s16 = sand.u32 1, %s3039_s25  }
  0x80   : > { %s559_s0 = scalar_lea.sflag [#allocation4], %s558_s16 }
  0x85   : > { %s560_s17 = sand.u32 1, %s3557_s14  }
  0x86   : > { %s2045_s30 = sshll.u32 %s560_s17, 7 }
  0x87   : > { %s3257_s2 = scalar_lea.vmem [#allocation11], %s2045_s30 }
  0x88   : > { %2919 = dma.done.wait (%p3063_p8), %s559_s0, 8224  }
  0x89   : > { %2921 = vsyncadd (%p3063_p8), %s559_s0, 4294959072  ;;  %s3263_s15 = sshll.u32 %s560_s17, 1  ;;  %p667_p5 = scmp.lt.s32.totalorder %s3039_s25, 1 }
  0x8a   : > { %s3559_s6 = sld [smem:[#allocation29_spill]]  ;;  %s3277_s24 = scalar_lea.vmem [#allocation12], %s2045_s30 }
  0x8b   : > { %s668_s29 = scalar_select %p667_p5, %s3039_s25, 1 }
  0x8c   : > { %s3560_s26 = sld [smem:[#allocation31_spill]]  ;;  %s582_s18 = scalar_lea.vmem [#allocation13], %s3263_s15 }
  0x8d   : > { %s2050_s22 = sshll.u32 %s668_s29, 1  ;;  %s3280_s12 = scalar_lea.vmem [#allocation14], %s2045_s30 }
  0x8e   : > { %s3282_s20 = scalar_lea.vmem [#allocation15], %s2045_s30  ;;  %679 = sbr.rel (%p2021_p9) target bundleno = 156 (0x9c), region = 108 }
  0x90   : > { %s3270_s28 = scalar_lea.vmem %s3559_s6, %s2050_s22 }
  0x92   : > { %s3275_s11 = scalar_lea.vmem %s3560_s26, %s2050_s22 }
  0x93   : > { %v680_v0 = vld [vmem:[#allocation3] sm:$0xff]  ;;  %v681_v1 = vld [vmem:[#allocation3 + $0x8] sm:$0xff]  ;;  %v682_v2 = vld [vmem:[#allocation3 + $0x10] sm:$0xff] }
  0x94   : > { %688 = vst [vmem:[#allocation2 + $0x30] sm:$0xff] %v680_v0  ;;  %v683_v3 = vld [vmem:[#allocation3 + $0x18] sm:$0xff]  ;;  %v684_v4 = vld [vmem:[#allocation3 + $0x20] sm:$0xff]  ;;  %v685_v5 = vld [vmem:[#allocation3 + $0x28] sm:$0xff] }
  0x95   : > { %689 = vst [vmem:[#allocation2] sm:$0xff] %v681_v1  ;;  %v686_v6 = vld [vmem:[#allocation3 + $0x30] sm:$0xff]  ;;  %v687_v7 = vld [vmem:[#allocation3 + $0x38] sm:$0xff] }
  0x96   : > { %690 = vst [vmem:[#allocation2 + $0x18] sm:$0xff] %v682_v2 }
  0x97   : > { %691 = vst [vmem:[#allocation2 + $0x10] sm:$0xff] %v683_v3 }
  0x98   : > { %692 = vst [vmem:[#allocation2 + $0x8] sm:$0xff] %v684_v4 }
  0x99   : > { %693 = vst [vmem:[#allocation2 + $0x20] sm:$0xff] %v685_v5 }
  0x9a   : > { %694 = vst [vmem:[#allocation2 + $0x28] sm:$0xff] %v686_v6 }
  0x9b   : > { %695 = vst [vmem:[#allocation2 + $0x38] sm:$0xff] %v687_v7 }
  0x9c PF: > { %v2400_v8 = vld [vmem:[%s3257_s2 + $0x38] sm:$0xff]  ;;  %v2399_v10 = vld [vmem:[%s3257_s2 + $0x30] sm:$0xff]  ;;  %v2398_v12 = vld [vmem:[%s3257_s2 + $0x28] sm:$0xff]  ;;  %vm1169_vm0 = vcmask 523264   ;;  %s3561_s21 = sld [smem:[#allocation27_spill]]  ;;  %p2383_p8 = scmp.ge.s32.totalorder %s3039_s25, 1 }
  0x9d   : > { %v2420_v9 = vld [vmem:[%s3257_s2 + $0x78] sm:$0xff]  ;;  %776 = vmatpush.bf16.msra.mxu0 %v2400_v8  ;;  %v2419_v11 = vld [vmem:[%s3257_s2 + $0x70] sm:$0xff]  ;;  %v2418_v13 = vld [vmem:[%s3257_s2 + $0x68] sm:$0xff] }
  0x9e   : > { %996 = vmatpush.bf16.msra.mxu2 %v2420_v9  ;;  %v2397_v14 = vld [vmem:[%s3257_s2 + $0x20] sm:$0xff]  ;;  %v2396_v16 = vld [vmem:[%s3257_s2 + $0x18] sm:$0xff]  ;;  %v2395_v18 = vld [vmem:[%s3257_s2 + $0x10] sm:$0xff] }
  0x9f   : > { %v2417_v15 = vld [vmem:[%s3257_s2 + $0x60] sm:$0xff]  ;;  %v2416_v17 = vld [vmem:[%s3257_s2 + $0x58] sm:$0xff]  ;;  %v2415_v19 = vld [vmem:[%s3257_s2 + $0x50] sm:$0xff] }
  0xa0   : > { %v2394_v20 = vld [vmem:[%s3257_s2 + $0x8] sm:$0xff]  ;;  %v2393_v22 = vld [vmem:[%s3257_s2] sm:$0xff]  ;;  %v696_v24 = vld [vmem:[#allocation2 + $0x30] sm:$0xff] }
  0xa1   : > { %777 = vmatpush.bf16.msra.mxu0 %v2399_v10  ;;  %v2414_v21 = vld [vmem:[%s3257_s2 + $0x48] sm:$0xff]  ;;  %v2413_v23 = vld [vmem:[%s3257_s2 + $0x40] sm:$0xff]  ;;  %v698_v27 = vld [vmem:[#allocation2 + $0x18] sm:$0xff] }
  0xa2   : > { %997 = vmatpush.bf16.msra.mxu2 %v2419_v11  ;;  %v697_v25 = vld [vmem:[#allocation2] sm:$0xff]  ;;  %v699_v28 = vld [vmem:[#allocation2 + $0x10] sm:$0xff]  ;;  %v2408_v30 = vld [vmem:[%s3277_s24 + $0x38] sm:$0xff]  ;;  %s3562_s16 = smov %s3561_s21 }
  0xa3   : > { %v3302_v26 = vpack.c.bf16 %v697_v25, %v696_v24  ;;  %v3306_v29 = vpack.c.bf16 %v699_v28, %v698_v27  ;;  %v2428_v31 = vld [vmem:[%s3277_s24 + $0x78] sm:$0xff]  ;;  %885 = vmatpush.bf16.msra.mxu1 %v2408_v30  ;;  %v2407_v32 = vld [vmem:[%s3277_s24 + $0x30] sm:$0xff]  ;;  %v2406_v34 = vld [vmem:[%s3277_s24 + $0x28] sm:$0xff] }
  0xa4   : > { %1107 = vmatpush.bf16.msra.mxu3 %v2428_v31  ;;  %v2427_v33 = vld [vmem:[%s3277_s24 + $0x70] sm:$0xff]  ;;  %v2426_v35 = vld [vmem:[%s3277_s24 + $0x68] sm:$0xff]  ;;  %v701_v37 = vld [vmem:[#allocation2 + $0x20] sm:$0xff] }
  0xa5   : > { %778 = vmatpush.bf16.msra.mxu0 %v2398_v12  ;;  %v700_v36 = vld [vmem:[#allocation2 + $0x8] sm:$0xff]  ;;  %v2405_v38 = vld [vmem:[%s3277_s24 + $0x20] sm:$0xff]  ;;  %v703_v41 = vld [vmem:[#allocation2 + $0x38] sm:$0xff] }
  0xa6   : > { %998 = vmatpush.bf16.msra.mxu2 %v2418_v13  ;;  %v3317_v39 = vpack.c.bf16 %v701_v37, %v700_v36  ;;  %v702_v40 = vld [vmem:[#allocation2 + $0x28] sm:$0xff]  ;;  %v2404_v43 = vld [vmem:[%s3277_s24 + $0x18] sm:$0xff]  ;;  %v2425_v44 = vld [vmem:[%s3277_s24 + $0x60] sm:$0xff] }
  0xa7   : > { %886 = vmatpush.bf16.msra.mxu1 %v2407_v32  ;;  %v3321_v42 = vpack.c.bf16 %v703_v41, %v702_v40  ;;  %v2403_v45 = vld [vmem:[%s3277_s24 + $0x10] sm:$0xff]  ;;  %v2424_v46 = vld [vmem:[%s3277_s24 + $0x58] sm:$0xff]  ;;  %v2402_v47 = vld [vmem:[%s3277_s24 + $0x8] sm:$0xff] }
  0xa8   : > { %1108 = vmatpush.bf16.msra.mxu3 %v2427_v33  ;;  %v2423_v48 = vld [vmem:[%s3277_s24 + $0x50] sm:$0xff]  ;;  %v2401_v49 = vld [vmem:[%s3277_s24] sm:$0xff]  ;;  %v2422_v50 = vld [vmem:[%s3277_s24 + $0x48] sm:$0xff] }
  0xa9   : > { %779 = vmatpush.bf16.msra.mxu0 %v2397_v14  ;;  %v2421_v51 = vld [vmem:[%s3277_s24 + $0x40] sm:$0xff] }
  0xaa   : > { %999 = vmatpush.bf16.msra.mxu2 %v2417_v15  ;;  %v2580_v53 = vld [vmem:[%s3270_s28] ss:$0 sm:$0xff]  ;;  %v2581_v58 = vld [vmem:[%s3270_s28 + $0x1] ss:$0 sm:$0xff] }
  0xab   : > { %887 = vmatpush.bf16.msra.mxu1 %v2406_v34 }
  0xac   : > { %1109 = vmatpush.bf16.msra.mxu3 %v2426_v35 }
  0xad   : > { %780 = vmatpush.bf16.msra.mxu0 %v2396_v16 }
  0xae   : > { %1000 = vmatpush.bf16.msra.mxu2 %v2416_v17 }
  0xaf   : > { %888 = vmatpush.bf16.msra.mxu1 %v2405_v38 }
  0xb0   : > { %1110 = vmatpush.bf16.msra.mxu3 %v2425_v44 }
  0xb1   : > { %781 = vmatpush.bf16.msra.mxu0 %v2395_v18 }
  0xb2   : > { %1001 = vmatpush.bf16.msra.mxu2 %v2415_v19 }
  0xb3   : > { %889 = vmatpush.bf16.msra.mxu1 %v2404_v43 }
  0xb4   : > { %1111 = vmatpush.bf16.msra.mxu3 %v2424_v46 }
  0xb5   : > { %782 = vmatpush.bf16.msra.mxu0 %v2394_v20 }
  0xb6   : > { %1002 = vmatpush.bf16.msra.mxu2 %v2414_v21 }
  0xb7   : > { %890 = vmatpush.bf16.msra.mxu1 %v2403_v45 }
  0xb8   : > { %1112 = vmatpush.bf16.msra.mxu3 %v2423_v48 }
  0xb9   : > { %783 = vmatpush.bf16.msra.mxu0 %v2393_v22 }
  0xba   : > { %1003 = vmatpush.bf16.msra.mxu2 %v2413_v23 }
  0xbb   : > { %891 = vmatpush.bf16.msra.mxu1 %v2402_v47 }
  0xbc   : > { %784 = vmatmul.bf16.vlgmr.msra.gmra.mxu0 %v3302_v26  ;;  %1113 = vmatpush.bf16.msra.mxu3 %v2422_v50 }
  0xbd   : > { %1004 = vmatmul.bf16.vlgmr.msra.gmra.mxu2 %v3302_v26 }
  0xbf   : > { %892 = vmatpush.bf16.msra.mxu1 %v2401_v49 }
  0xc0   : > { %1114 = vmatpush.bf16.msra.mxu3 %v2421_v51 }
  0xcc   : > { %789 = vmatmul.bf16.gmra.mxu0 %v3306_v29 }
  0xcd   : > { %1009 = vmatmul.bf16.gmra.mxu2 %v3306_v29 }
  0xdc   : > { %794 = vmatmul.bf16.gmra.mxu0 %v3317_v39 }
  0xdd   : > { %1014 = vmatmul.bf16.gmra.mxu2 %v3317_v39 }
  0xec   : > { %799 = vmatmul.bf16.gmra.mxu0 %v3321_v42 }
  0xed   : > { %1019 = vmatmul.bf16.gmra.mxu2 %v3321_v42 }
 0x139   : > { %v785_v52 = vpop.f32.mrf.mxu0 }
 0x13a   : > { %v786_v54 = vadd.f32 %v2580_v53, %v785_v52 }
 0x13c   : > { %v805_v57 = vmax.f32 %v786_v54, 0.0 }
 0x140   : > { %v1005_v55 = vpop.f32.mrf.mxu2 }
 0x141   : > { %v787_v56 = vpop.f32.mrf.mxu0  ;;  %v1006_v61 = vadd.f32 %v2581_v58, %v1005_v55 }
 0x142   : > { %v788_v59 = vadd.f32 %v2580_v53, %v787_v56 }
 0x143   : > { %v1025_v2 = vmax.f32 %v1006_v61, 0.0 }
 0x144   : > { %v806_v60 = vmax.f32 %v788_v59, 0.0 }
 0x146   : > { %v813_v62 = vpack.c.bf16 %v806_v60, %v805_v57 }
 0x148   : > { %v1007_v63 = vpop.f32.mrf.mxu2  ;;  %893 = vmatmul.bf16.vlgmr.msra.gmra.mxu1 %v813_v62 }
 0x149   : > { %v1008_v0 = vadd.f32 %v2581_v58, %v1007_v63  ;;  %v790_v1 = vpop.f32.mrf.mxu0  ;;  %v2582_v63 = vld [vmem:[%s582_s18] ss:$0 sm:$0xff] }
 0x14a   : > { %v791_v5 = vadd.f32 %v2580_v53, %v790_v1 }
 0x14b   : > { %v1026_v3 = vmax.f32 %v1008_v0, 0.0 }
 0x14c   : > { %v807_v8 = vmax.f32 %v791_v5, 0.0 }
 0x14d   : > { %v1033_v4 = vpack.c.bf16 %v1026_v3, %v1025_v2 }
 0x14f   : > { %1115 = vmatmul.bf16.vlgmr.msra.gmra.mxu3 %v1033_v4 }
 0x150   : > { %v1010_v6 = vpop.f32.mrf.mxu2 }
 0x151   : > { %v792_v7 = vpop.f32.mrf.mxu0  ;;  %v1011_v11 = vadd.f32 %v2581_v58, %v1010_v6 }
 0x152   : > { %v793_v9 = vadd.f32 %v2580_v53, %v792_v7 }
 0x153   : > { %v1027_v16 = vmax.f32 %v1011_v11, 0.0  ;;  %v2583_v11 = vld [vmem:[%s582_s18 + $0x1] ss:$0 sm:$0xff] }
 0x154   : > { %v808_v10 = vmax.f32 %v793_v9, 0.0 }
 0x156   : > { %v814_v12 = vpack.c.bf16 %v808_v10, %v807_v8 }
 0x158   : > { %v1012_v13 = vpop.f32.mrf.mxu2  ;;  %898 = vmatmul.bf16.gmra.mxu1 %v814_v12 }
 0x159   : > { %v1013_v14 = vadd.f32 %v2581_v58, %v1012_v13  ;;  %v795_v15 = vpop.f32.mrf.mxu0 }
 0x15a   : > { %v796_v19 = vadd.f32 %v2580_v53, %v795_v15 }
 0x15b   : > { %v1028_v17 = vmax.f32 %v1013_v14, 0.0 }
 0x15c   : > { %v809_v22 = vmax.f32 %v796_v19, 0.0 }
 0x15d   : > { %v1034_v18 = vpack.c.bf16 %v1028_v17, %v1027_v16 }
 0x15f   : > { %1120 = vmatmul.bf16.gmra.mxu3 %v1034_v18 }
 0x160   : > { %v1015_v20 = vpop.f32.mrf.mxu2 }
 0x161   : > { %v797_v21 = vpop.f32.mrf.mxu0  ;;  %v1016_v25 = vadd.f32 %v2581_v58, %v1015_v20  ;;  %v2409_v20 = vld [vmem:[#allocation6] sm:$0xff] }
 0x162   : > { %v798_v23 = vadd.f32 %v2580_v53, %v797_v21 }
 0x163   : > { %v1029_v32 = vmax.f32 %v1016_v25, 0.0 }
 0x164   : > { %v810_v24 = vmax.f32 %v798_v23, 0.0 }
 0x166   : > { %v815_v27 = vpack.c.bf16 %v810_v24, %v809_v22 }
 0x168   : > { %v1017_v28 = vpop.f32.mrf.mxu2  ;;  %903 = vmatmul.bf16.gmra.mxu1 %v815_v27 }
 0x169   : > { %v1018_v30 = vadd.f32 %v2581_v58, %v1017_v28  ;;  %v800_v31 = vpop.f32.mrf.mxu0 }
 0x16a   : > { %v801_v35 = vadd.f32 %v2580_v53, %v800_v31  ;;  %v2429_v31 = vld [vmem:[#allocation6 + $0x20] sm:$0xff] }
 0x16b   : > { %v1030_v33 = vmax.f32 %v1018_v30, 0.0 }
 0x16c   : > { %v811_v38 = vmax.f32 %v801_v35, 0.0  ;;  %v2313_v35 = vld [vmem:[%s3282_s20 + $0x70] sm:$0xf] }
 0x16d   : > { %v1035_v34 = vpack.c.bf16 %v1030_v33, %v1029_v32  ;;  %v2410_v32 = vld [vmem:[#allocation6 + $0x8] sm:$0xff] }
 0x16e   : > { %v2430_v33 = vld [vmem:[#allocation6 + $0x28] sm:$0xff] }
 0x16f   : > { %1125 = vmatmul.bf16.gmra.mxu3 %v1035_v34  ;;  %v2411_v34 = vld [vmem:[#allocation6 + $0x10] sm:$0xff] }
 0x170   : > { %v1020_v36 = vpop.f32.mrf.mxu2 }
 0x171   : > { %v802_v37 = vpop.f32.mrf.mxu0  ;;  %v1021_v43 = vadd.f32 %v2581_v58, %v1020_v36  ;;  %v2464_v36 = vld [vmem:[%s3282_s20 + $0x74] sm:$0xf0] }
 0x172   : > { %v803_v40 = vadd.f32 %v2580_v53, %v802_v37  ;;  %v2463_v37 = vld [vmem:[%s3282_s20 + $0x74] sm:$0xf] }
 0x173   : > { %v1031_v47 = vmax.f32 %v1021_v43, 0.0  ;;  %v2448_v43 = vld [vmem:[%s3280_s12 + $0x74] sm:$0xf0] }
 0x174   : > { %v812_v41 = vmax.f32 %v803_v40, 0.0  ;;  %v2315_v40 = vld [vmem:[%s3282_s20 + $0x78] sm:$0xf0] }
 0x176   : > { %v816_v44 = vpack.c.bf16 %v812_v41, %v811_v38  ;;  %v2314_v38 = vor.u32 %v2464_v36, %v2313_v35  ;;  %v2377_v41 = vld [vmem:[%s3280_s12 + $0x70] sm:$0xf]  ;;  %v2347_v36 = vld [vmem:[%s3280_s12 + $0x38] sm:$0xf0] }
 0x178   : > { %v1022_v45 = vpop.f32.mrf.mxu2  ;;  %908 = vmatmul.bf16.gmra.mxu1 %v816_v44  ;;  %v2318_v44 = vor.u32 %v2463_v37, %v2315_v40  ;;  %1388 = vmatpush.bf16.msrb.mxu2 %v2314_v38  ;;  %v2337_v38 = vld [vmem:[%s3280_s12 + $0x20] sm:$0xf]  ;;  %v2438_v40 = vld [vmem:[%s3280_s12 + $0x24] sm:$0xf0] }
 0x179   : > { %v1023_v46 = vadd.f32 %v2581_v58, %v1022_v45  ;;  %v2378_v45 = vor.u32 %v2448_v43, %v2377_v41  ;;  %v2437_v41 = vld [vmem:[%s3280_s12 + $0x24] sm:$0xf]  ;;  %v2338_v43 = vor.u32 %v2438_v40, %v2337_v38  ;;  %v1680_v38 = vld [vmem:[#allocation9 + $0x50] sm:$0xff] }
 0x17a   : > { %1417 = vmatpush.bf16.msrb.mxu3 %v2318_v44  ;;  %v2339_v44 = vld [vmem:[%s3280_s12 + $0x28] sm:$0xf0]  ;;  %v1679_v40 = vld [vmem:[#allocation9 + $0x48] sm:$0xff] }
 0x17b   : > { %v1032_v48 = vmax.f32 %v1023_v46, 0.0  ;;  %v2447_v46 = vld [vmem:[%s3280_s12 + $0x74] sm:$0xf] }
 0x17d   : > { %v1036_v49 = vpack.c.bf16 %v1032_v48, %v1031_v47  ;;  %v2379_v47 = vld [vmem:[%s3280_s12 + $0x78] sm:$0xf0]  ;;  %v2305_v48 = vld [vmem:[%s3282_s20 + $0x60] sm:$0xf] }
 0x17f   : > { %1130 = vmatmul.bf16.gmra.mxu3 %v1036_v49  ;;  %v2382_v49 = vor.u32 %v2447_v46, %v2379_v47  ;;  %v2454_v46 = vld [vmem:[%s3282_s20 + $0x24] sm:$0xf0]  ;;  %v2453_v47 = vld [vmem:[%s3282_s20 + $0x24] sm:$0xf] }
 0x1c5   : > { %v894_v50 = vpop.f32.mrf.mxu1 }
 0x1c6   : > { %v895_v14 = vadd.f32 %v2582_v63, %v894_v50  ;;  %v2462_v50 = vld [vmem:[%s3282_s20 + $0x64] sm:$0xf0] }
 0x1cd   : > { %v896_v51 = vpop.f32.mrf.mxu1 }
 0x1ce   : > { %v897_v10 = vadd.f32 %v2582_v63, %v896_v51  ;;  %v2461_v51 = vld [vmem:[%s3282_s20 + $0x64] sm:$0xf] }
 0x1d0   : > { %v922_v19 = vpack.c.bf16 %v897_v10, %v895_v14  ;;  %v2442_v14 = vld [vmem:[%s3280_s12 + $0x44] sm:$0xf0] }
 0x1d2   : > { %v1116_v52 = vpop.f32.mrf.mxu3 }
 0x1d3   : > { %v1117_v28 = vadd.f32 %v2583_v11, %v1116_v52  ;;  %v2307_v52 = vld [vmem:[%s3282_s20 + $0x68] sm:$0xf0] }
 0x1d5   : > { %v899_v54 = vpop.f32.mrf.mxu1 }
 0x1d6   : > { %v900_v9 = vadd.f32 %v2582_v63, %v899_v54  ;;  %v2306_v54 = vor.u32 %v2462_v50, %v2305_v48  ;;  %v2342_v48 = vor.u32 %v2437_v41, %v2339_v44  ;;  %v2275_v50 = vld [vmem:[%s3282_s20 + $0x28] sm:$0xf0] }
 0x1d8   : > { %1389 = vmatpush.bf16.msrb.mxu2 %v2306_v54  ;;  %v2452_v54 = vld [vmem:[%s3282_s20 + $0x14] sm:$0xf0] }
 0x1da   : > { %v1118_v55 = vpop.f32.mrf.mxu3 }
 0x1db   : > { %v1119_v25 = vadd.f32 %v2583_v11, %v1118_v55  ;;  %v2310_v55 = vor.u32 %v2461_v51, %v2307_v52  ;;  %v2278_v51 = vor.u32 %v2453_v47, %v2275_v50  ;;  %v2265_v52 = vld [vmem:[%s3282_s20 + $0x10] sm:$0xf]  ;;  %v1693_v50 = vld [vmem:[#allocation9 + $0xb8] sm:$0xff] }
 0x1dd   : > { %v901_v56 = vpop.f32.mrf.mxu1  ;;  %v1145_v30 = vpack.c.bf16 %v1119_v25, %v1117_v28  ;;  %1418 = vmatpush.bf16.msrb.mxu3 %v2310_v55  ;;  %v2283_v25 = vld [vmem:[%s3282_s20 + $0x38] sm:$0xf0]  ;;  %v2412_v28 = vld [vmem:[#allocation6 + $0x18] sm:$0xff] }
 0x1de   : > { %v902_v7 = vadd.f32 %v2582_v63, %v901_v56  ;;  %v2369_v56 = vld [vmem:[%s3280_s12 + $0x60] sm:$0xf]  ;;  %v2451_v55 = vld [vmem:[%s3282_s20 + $0x14] sm:$0xf] }
 0x1e0   : > { %v923_v12 = vpack.c.bf16 %v902_v7, %v900_v9  ;;  %v2289_v7 = vld [vmem:[%s3282_s20 + $0x40] sm:$0xf] }
 0x1e2   : > { %v1121_v57 = vpop.f32.mrf.mxu3 }
 0x1e3   : > { %v1122_v24 = vadd.f32 %v2583_v11, %v1121_v57  ;;  %v2446_v57 = vld [vmem:[%s3280_s12 + $0x64] sm:$0xf0] }
 0x1e5   : > { %v904_v59 = vpop.f32.mrf.mxu1 }
 0x1e6   : > { %v905_v6 = vadd.f32 %v2582_v63, %v904_v59  ;;  %v2445_v59 = vld [vmem:[%s3280_s12 + $0x64] sm:$0xf] }
 0x1ea   : > { %v1123_v53 = vpop.f32.mrf.mxu3 }
 0x1eb   : > { %v1124_v22 = vadd.f32 %v2583_v11, %v1123_v53  ;;  %v2370_v53 = vor.u32 %v2446_v57, %v2369_v56  ;;  %v2266_v56 = vor.u32 %v2452_v54, %v2265_v52  ;;  %v2267_v57 = vld [vmem:[%s3282_s20 + $0x18] sm:$0xf0]  ;;  %v1692_v54 = vld [vmem:[#allocation9 + $0xb0] sm:$0xff] }
 0x1ed   : > { %v906_v60 = vpop.f32.mrf.mxu1  ;;  %v1146_v27 = vpack.c.bf16 %v1124_v22, %v1122_v24  ;;  %v2455_v24 = vld [vmem:[%s3282_s20 + $0x34] sm:$0xf] }
 0x1ee   : > { %v907_v3 = vadd.f32 %v2582_v63, %v906_v60  ;;  %v2371_v60 = vld [vmem:[%s3280_s12 + $0x68] sm:$0xf0] }
 0x1f0   : > { %v924_v8 = vpack.c.bf16 %v907_v3, %v905_v6  ;;  %v2444_v3 = vld [vmem:[%s3280_s12 + $0x54] sm:$0xf0] }
 0x1f2   : > { %v1126_v61 = vpop.f32.mrf.mxu3 }
 0x1f3   : > { %v1127_v21 = vadd.f32 %v2583_v11, %v1126_v61  ;;  %v2297_v61 = vld [vmem:[%s3282_s20 + $0x50] sm:$0xf] }
 0x1f5   : > { %v909_v62 = vpop.f32.mrf.mxu1 }
 0x1f6   : > { %v910_v1 = vadd.f32 %v2582_v63, %v909_v62  ;;  %v2460_v62 = vld [vmem:[%s3282_s20 + $0x54] sm:$0xf0] }
 0x1fa   : > { %v1128_v58 = vpop.f32.mrf.mxu3 }
 0x1fb   : > { %v1129_v17 = vadd.f32 %v2583_v11, %v1128_v58  ;;  %v2374_v58 = vor.u32 %v2445_v59, %v2371_v60  ;;  %v2329_v59 = vld [vmem:[%s3280_s12 + $0x10] sm:$0xf]  ;;  %v2270_v60 = vor.u32 %v2451_v55, %v2267_v57  ;;  %v1675_v55 = vld [vmem:[#allocation9 + $0x28] sm:$0xff] }
 0x1fc   : > { %v1691_v57 = vld [vmem:[#allocation9 + $0xa8] sm:$0xff] }
 0x1fd   : > { %v911_v0 = vpop.f32.mrf.mxu1  ;;  %v1147_v23 = vpack.c.bf16 %v1129_v17, %v1127_v21  ;;  %v2456_v21 = vld [vmem:[%s3282_s20 + $0x34] sm:$0xf0] }
 0x1fe   : > { %v912_v2 = vadd.f32 %v2582_v63, %v911_v0  ;;  %v2459_v63 = vld [vmem:[%s3282_s20 + $0x54] sm:$0xf]  ;;  %v2299_v0 = vld [vmem:[%s3282_s20 + $0x58] sm:$0xf0] }
 0x1ff   : > { %v2302_v6 = vor.u32 %v2459_v63, %v2299_v0  ;;  %v2321_v0 = vld [vmem:[%s3280_s12] sm:$0xf] }
 0x200   : > { %v925_v4 = vpack.c.bf16 %v912_v2, %v910_v1  ;;  %v2361_v1 = vld [vmem:[%s3280_s12 + $0x50] sm:$0xf]  ;;  %v2298_v2 = vor.u32 %v2460_v62, %v2297_v61  ;;  %v2435_v62 = vld [vmem:[%s3280_s12 + $0x14] sm:$0xf] }
 0x201   : > { %v2362_v9 = vor.u32 %v2444_v3, %v2361_v1  ;;  %1419 = vmatpush.bf16.msrb.mxu3 %v2302_v6  ;;  %v2434_v1 = vld [vmem:[%s3280_s12 + $0x4] sm:$0xf0] }
 0x202   : > { %v1131_v5 = vpop.f32.mrf.mxu3  ;;  %1247 = vmatpush.bf16.msrb.mxu1 %v925_v4  ;;  %v2443_v4 = vld [vmem:[%s3280_s12 + $0x54] sm:$0xf]  ;;  %1390 = vmatpush.bf16.msrb.mxu2 %v2298_v2  ;;  %v2433_v2 = vld [vmem:[%s3280_s12 + $0x4] sm:$0xf]  ;;  %v2322_v3 = vor.u32 %v2434_v1, %v2321_v0  ;;  %v2450_v6 = vld [vmem:[%s3282_s20 + $0x4] sm:$0xf0] }
 0x203   : > { %v1132_v15 = vadd.f32 %v2583_v11, %v1131_v5  ;;  %v2363_v5 = vld [vmem:[%s3280_s12 + $0x58] sm:$0xf0]  ;;  %v1673_v0 = vld [vmem:[#allocation9 + $0x18] sm:$0xff] }
 0x204   : > { %v2366_v10 = vor.u32 %v2443_v4, %v2363_v5  ;;  %v2323_v4 = vld [vmem:[%s3280_s12 + $0x8] sm:$0xf0]  ;;  %v2257_v5 = vld [vmem:[%s3282_s20] sm:$0xf]  ;;  %v1689_v1 = vld [vmem:[#allocation9 + $0x98] sm:$0xff] }
 0x206   : > { %1248 = vmatpush.bf16.msrb.mxu1 %v924_v8  ;;  %v2458_v8 = vld [vmem:[%s3282_s20 + $0x44] sm:$0xf0] }
 0x207   : > { %v2290_v17 = vor.u32 %v2458_v8, %v2289_v7  ;;  %v2449_v7 = vld [vmem:[%s3282_s20 + $0x4] sm:$0xf]  ;;  %v2326_v8 = vor.u32 %v2433_v2, %v2323_v4  ;;  %v1672_v2 = vld [vmem:[#allocation9 + $0x10] sm:$0xff] }
 0x208   : > { %v1671_v4 = vld [vmem:[#allocation9 + $0x8] sm:$0xff] }
 0x209   : > { %1391 = vmatpush.bf16.msrb.mxu2 %v2290_v17 }
 0x20a   : > { %v1133_v13 = vpop.f32.mrf.mxu3  ;;  %1249 = vmatpush.bf16.msrb.mxu1 %v923_v12  ;;  %v2291_v12 = vld [vmem:[%s3282_s20 + $0x48] sm:$0xf0] }
 0x20b   : > { %v1134_v16 = vadd.f32 %v2583_v11, %v1133_v13  ;;  %v2457_v11 = vld [vmem:[%s3282_s20 + $0x44] sm:$0xf]  ;;  %v2353_v13 = vld [vmem:[%s3280_s12 + $0x40] sm:$0xf] }
 0x20c   : > { %v2354_v22 = vor.u32 %v2442_v14, %v2353_v13 }
 0x20d   : > { %v1148_v18 = vpack.c.bf16 %v1134_v16, %v1132_v15  ;;  %v2441_v15 = vld [vmem:[%s3280_s12 + $0x44] sm:$0xf]  ;;  %v2355_v16 = vld [vmem:[%s3280_s12 + $0x48] sm:$0xf0] }
 0x20e   : > { %1250 = vmatpush.bf16.msrb.mxu1 %v922_v19  ;;  %v2294_v19 = vor.u32 %v2457_v11, %v2291_v12 }
 0x20f   : > { %1186 = vmatpush.bf16.msrb.mxu0 %v1148_v18  ;;  %v2431_v18 = vld [vmem:[#allocation6 + $0x30] sm:$0xff] }
 0x210   : > { %1420 = vmatpush.bf16.msrb.mxu3 %v2294_v19 }
 0x211   : > { %2251 = vmatmul.msk.bf16.vlgmr.msrb.gmra.mxu1 %vm1169_vm0, %v2409_v20  ;;  %v2281_v20 = vld [vmem:[%s3282_s20 + $0x30] sm:$0xf] }
 0x212   : > { %1555 = vmatpush.bf16.msra.mxu1 %v2382_v49 }
 0x213   : > { %1187 = vmatpush.bf16.msrb.mxu0 %v1147_v23  ;;  %v2358_v23 = vor.u32 %v2441_v15, %v2355_v16 }
 0x216   : > { %1556 = vmatpush.bf16.msra.mxu1 %v2374_v58  ;;  %v2331_v58 = vld [vmem:[%s3280_s12 + $0x18] sm:$0xf0] }
 0x217   : > { %1188 = vmatpush.bf16.msrb.mxu0 %v1146_v27  ;;  %v2282_v27 = vor.u32 %v2456_v21, %v2281_v20  ;;  %v2334_v63 = vor.u32 %v2435_v62, %v2331_v58  ;;  %v1674_v58 = vld [vmem:[#allocation9 + $0x20] sm:$0xff] }
 0x219   : > { %1392 = vmatpush.bf16.msrb.mxu2 %v2282_v27  ;;  %v1701_v27 = vld [vmem:[#allocation9 + $0xf8] sm:$0xff] }
 0x21a   : > { %1557 = vmatpush.bf16.msra.mxu1 %v2366_v10  ;;  %v2259_v10 = vld [vmem:[%s3282_s20 + $0x8] sm:$0xf0] }
 0x21b   : > { %1189 = vmatpush.bf16.msrb.mxu0 %v1145_v30  ;;  %v2286_v30 = vor.u32 %v2455_v24, %v2283_v25  ;;  %v2262_v11 = vor.u32 %v2449_v7, %v2259_v10  ;;  %v1686_v7 = vld [vmem:[#allocation9 + $0x80] sm:$0xff] }
 0x21d   : > { %1421 = vmatpush.bf16.msrb.mxu3 %v2286_v30  ;;  %v1700_v30 = vld [vmem:[#allocation9 + $0xf0] sm:$0xff] }
 0x21e   : > { %2231 = vmatmul.msk.bf16.vlgmr.msrb.gmra.mxu0 %vm1169_vm0, %v2429_v31  ;;  %1558 = vmatpush.bf16.msra.mxu1 %v2358_v23  ;;  %v2432_v31 = vld [vmem:[#allocation6 + $0x38] sm:$0xff] }
 0x21f   : > { %1526 = vmatpush.bf16.msra.mxu0 %v2378_v45  ;;  %v2273_v45 = vld [vmem:[%s3282_s20 + $0x20] sm:$0xf] }
 0x220   : > { %v2274_v49 = vor.u32 %v2454_v46, %v2273_v45  ;;  %v1678_v46 = vld [vmem:[#allocation9 + $0x40] sm:$0xff] }
 0x221   : > { %2252 = vmatmul.msk.bf16.gmra.mxu1 %vm1169_vm0, %v2410_v32  ;;  %v2345_v32 = vld [vmem:[%s3280_s12 + $0x30] sm:$0xf]  ;;  %1422 = vmatpush.bf16.msrb.mxu3 %v2278_v51 }
 0x222   : > { %1393 = vmatpush.bf16.msrb.mxu2 %v2274_v49  ;;  %v1677_v49 = vld [vmem:[#allocation9 + $0x38] sm:$0xff]  ;;  %v1676_v51 = vld [vmem:[#allocation9 + $0x30] sm:$0xff] }
 0x223   : > { %1527 = vmatpush.bf16.msra.mxu0 %v2370_v53  ;;  %v2436_v53 = vld [vmem:[%s3280_s12 + $0x14] sm:$0xf0] }
 0x224   : > { %v2330_v61 = vor.u32 %v2436_v53, %v2329_v59 }
 0x225   : > { %1423 = vmatpush.bf16.msrb.mxu3 %v2270_v60 }
 0x226   : > { %1394 = vmatpush.bf16.msrb.mxu2 %v2266_v56 }
 0x227   : > { %1528 = vmatpush.bf16.msra.mxu0 %v2362_v9  ;;  %v2258_v9 = vor.u32 %v2450_v6, %v2257_v5  ;;  %v1687_v5 = vld [vmem:[#allocation9 + $0x88] sm:$0xff]  ;;  %v1670_v6 = vld [vmem:[#allocation9] sm:$0xff] }
 0x229   : > { %1424 = vmatpush.bf16.msrb.mxu3 %v2262_v11 }
 0x22a   : > { %1395 = vmatpush.bf16.msrb.mxu2 %v2258_v9 }
 0x22b   : > { %1529 = vmatpush.bf16.msra.mxu0 %v2354_v22 }
 0x22d   : > { %1743 = vmatpush.msra.mxu3 %v1701_v27 }
 0x22e   : > { %2232 = vmatmul.msk.bf16.gmra.mxu0 %vm1169_vm0, %v2430_v33  ;;  %v2440_v33 = vld [vmem:[%s3280_s12 + $0x34] sm:$0xf0] }
 0x22f   : > { %v2346_v35 = vor.u32 %v2440_v33, %v2345_v32  ;;  %v1699_v32 = vld [vmem:[#allocation9 + $0xe8] sm:$0xff]  ;;  %1744 = vmatpush.msra.mxu3 %v1700_v30  ;;  %v1682_v33 = vld [vmem:[#allocation9 + $0x60] sm:$0xff] }
 0x231   : > { %2253 = vmatmul.msk.bf16.gmra.mxu1 %vm1169_vm0, %v2411_v34  ;;  %v2439_v34 = vld [vmem:[%s3280_s12 + $0x34] sm:$0xf]  ;;  %1530 = vmatpush.bf16.msra.mxu0 %v2346_v35 }
 0x232   : > { %v2350_v37 = vor.u32 %v2439_v34, %v2347_v36  ;;  %v1698_v34 = vld [vmem:[#allocation9 + $0xe0] sm:$0xff]  ;;  %1745 = vmatpush.msra.mxu3 %v1699_v32  ;;  %v1681_v35 = vld [vmem:[#allocation9 + $0x58] sm:$0xff] }
 0x234   : > { %1559 = vmatpush.bf16.msra.mxu1 %v2350_v37  ;;  %v1697_v37 = vld [vmem:[#allocation9 + $0xd8] sm:$0xff]  ;;  %1746 = vmatpush.msra.mxu3 %v1698_v34  ;;  %v1624_v34 = vld [vmem:[%s3562_s16 + $0x10] sm:$0xff] }
 0x235   : > { %1531 = vmatpush.bf16.msra.mxu0 %v2338_v43  ;;  %v1695_v43 = vld [vmem:[#allocation9 + $0xc8] sm:$0xff] }
 0x236   : > { %1747 = vmatpush.msra.mxu3 %v1697_v37 }
 0x238   : > { %1560 = vmatpush.bf16.msra.mxu1 %v2342_v48  ;;  %v1694_v48 = vld [vmem:[#allocation9 + $0xc0] sm:$0xff] }
 0x239   : > { %1532 = vmatpush.bf16.msra.mxu0 %v2330_v61 }
 0x23c   : > { %1561 = vmatpush.bf16.msra.mxu1 %v2334_v63  ;;  %v1690_v63 = vld [vmem:[#allocation9 + $0xa0] sm:$0xff] }
 0x23d   : > { %1533 = vmatpush.bf16.msra.mxu0 %v2322_v3  ;;  %v1688_v3 = vld [vmem:[#allocation9 + $0x90] sm:$0xff] }
 0x23e   : > { %2233 = vmatmul.msk.bf16.gmra.mxu0 %vm1169_vm0, %v2431_v18 }
 0x240   : > { %1562 = vmatpush.bf16.msra.mxu1 %v2326_v8 }
 0x241   : > { %2254 = vmatmul.msk.bf16.gmra.mxu1 %vm1169_vm0, %v2412_v28  ;;  %v1684_v28 = vld [vmem:[#allocation9 + $0x70] sm:$0xff] }
 0x24e   : > { %2234 = vmatmul.msk.bf16.gmra.mxu0 %vm1169_vm0, %v2432_v31 }
 0x251   : > { %1563 = vmatmul.bf16.vlgmr.msra.gmra.mxu1 %v3302_v26 }
 0x25e   : > { %1534 = vmatmul.bf16.vlgmr.msra.gmra.mxu0 %v3302_v26 }
 0x261   : > { %1568 = vmatmul.bf16.gmra.mxu1 %v3306_v29 }
 0x26e   : > { %1539 = vmatmul.bf16.gmra.mxu0 %v3306_v29  ;;  %v1685_v29 = vld [vmem:[#allocation9 + $0x78] sm:$0xff] }
 0x26f   : > { %1702 = vmatpush.msra.mxu2 %v1685_v29 }
 0x271   : > { %1573 = vmatmul.bf16.gmra.mxu1 %v3317_v39  ;;  %1703 = vmatpush.msra.mxu2 %v1684_v28 }
 0x27e   : > { %1544 = vmatmul.bf16.gmra.mxu0 %v3317_v39  ;;  %v1683_v39 = vld [vmem:[#allocation9 + $0x68] sm:$0xff] }
 0x27f   : > { %1704 = vmatpush.msra.mxu2 %v1683_v39 }
 0x281   : > { %1578 = vmatmul.bf16.gmra.mxu1 %v3321_v42  ;;  %1705 = vmatpush.msra.mxu2 %v1682_v33 }
 0x283   : > { %1706 = vmatpush.msra.mxu2 %v1681_v35  ;;  %v1625_v35 = vld [vmem:[%s3562_s16 + $0x18] sm:$0xff] }
 0x285   : > { %1707 = vmatpush.msra.mxu2 %v1680_v38 }
 0x287   : > { %1708 = vmatpush.msra.mxu2 %v1679_v40 }
 0x289   : > { %1709 = vmatpush.msra.mxu2 %v1678_v46 }
 0x28b   : > { %1710 = vmatpush.msra.mxu2 %v1677_v49  ;;  %v1626_v49 = vld [vmem:[%s3562_s16 + $0x20] sm:$0xff] }
 0x28d   : > { %1711 = vmatpush.msra.mxu2 %v1676_v51 }
 0x28e   : > { %v1252_v12 = vpop.f32.mrf.mxu1  ;;  %1549 = vmatmul.bf16.gmra.mxu0 %v3321_v42  ;;  %v1696_v42 = vld [vmem:[#allocation9 + $0xd0] sm:$0xff] }
 0x28f   : > { %1748 = vmatpush.msra.mxu3 %v1696_v42  ;;  %1712 = vmatpush.msra.mxu2 %v1675_v55 }
 0x291   : > { %1749 = vmatpush.msra.mxu3 %v1695_v43  ;;  %1713 = vmatpush.msra.mxu2 %v1674_v58 }
 0x293   : > { %1750 = vmatpush.msra.mxu3 %v1694_v48  ;;  %1714 = vmatpush.msra.mxu2 %v1673_v0  ;;  %v1629_v0 = vld [vmem:[%s3562_s16 + $0x38] sm:$0xff] }
 0x295   : > { %1751 = vmatpush.msra.mxu3 %v1693_v50  ;;  %1715 = vmatpush.msra.mxu2 %v1672_v2  ;;  %v1627_v50 = vld [vmem:[%s3562_s16 + $0x28] sm:$0xff] }
 0x296   : > { %v1254_v13 = vpop.f32.mrf.mxu1 }
 0x297   : > { %1752 = vmatpush.msra.mxu3 %v1692_v54  ;;  %1716 = vmatpush.msra.mxu2 %v1671_v4 }
 0x299   : > { %1753 = vmatpush.msra.mxu3 %v1691_v57  ;;  %1717 = vmatpush.msra.mxu2 %v1670_v6 }
 0x29b   : > { %v1191_v14 = vpop.f32.mrf.mxu0  ;;  %1754 = vmatpush.msra.mxu3 %v1690_v63  ;;  %v1628_v63 = vld [vmem:[%s3562_s16 + $0x30] sm:$0xff] }
 0x29c   : > { %v1253_v17 = vadd.f32 %v1252_v12, %v1191_v14  ;;  %v1584_v12 = vld [vmem:[%s3275_s11] sm:$0x3] }
 0x29d   : > { %1755 = vmatpush.msra.mxu3 %v1689_v1  ;;  %v3423_v14 = vperm.slane %v1584_v12, 1 }
 0x29e   : > { %v1257_v15 = vpop.f32.mrf.mxu1 }
 0x29f   : > { %1756 = vmatpush.msra.mxu3 %v1688_v3 }
 0x2a1   : > { %1757 = vmatpush.msra.mxu3 %v1687_v5 }
 0x2a3   : > { %v1193_v16 = vpop.f32.mrf.mxu0  ;;  %1758 = vmatpush.msra.mxu3 %v1686_v7 }
 0x2a4   : > { %v1255_v18 = vadd.f32 %v1254_v13, %v1193_v16  ;;  %v3421_v13 = vperm.slane %v1584_v12, 0 }
 0x2a6   : > { %v1288_v19 = vpack.c.bf16 %v1255_v18, %v1253_v17  ;;  %v1259_v26 = vpop.f32.mrf.mxu1 }
 0x2a8   : > { %1396 = vmatmul.bf16.vlgmr.msrb.gmra.mxu2 %v1288_v19  ;;  %1425 = vmatmul.bf16.vlgmr.msrb.gmra.mxu3 %v1288_v19 }
 0x2ab   : > { %v1196_v20 = vpop.f32.mrf.mxu0 }
 0x2ac   : > { %v1258_v22 = vadd.f32 %v1257_v15, %v1196_v20 }
 0x2ae   : > { %v1262_v24 = vpop.f32.mrf.mxu1 }
 0x2b3   : > { %v1198_v21 = vpop.f32.mrf.mxu0 }
 0x2b4   : > { %v1260_v23 = vadd.f32 %v1259_v26, %v1198_v21  ;;  %v1622_v26 = vld [vmem:[%s3561_s21] sm:$0xff]  ;;  %v1623_v21 = vld [vmem:[%s3562_s16 + $0x8] sm:$0xff] }
 0x2b6   : > { %v1289_v25 = vpack.c.bf16 %v1260_v23, %v1258_v22  ;;  %v1264_v36 = vpop.f32.mrf.mxu1 }
 0x2b8   : > { %1401 = vmatmul.bf16.gmra.mxu2 %v1289_v25  ;;  %1430 = vmatmul.bf16.gmra.mxu3 %v1289_v25 }
 0x2bb   : > { %v1201_v31 = vpop.f32.mrf.mxu0 }
 0x2bc   : > { %v1263_v44 = vadd.f32 %v1262_v24, %v1201_v31 }
 0x2be   : > { %v1267_v52 = vpop.f32.mrf.mxu1 }
 0x2c3   : > { %v1203_v41 = vpop.f32.mrf.mxu0 }
 0x2c4   : > { %v1265_v45 = vadd.f32 %v1264_v36, %v1203_v41 }
 0x2c6   : > { %v1290_v47 = vpack.c.bf16 %v1265_v45, %v1263_v44  ;;  %v1269_v53 = vpop.f32.mrf.mxu1 }
 0x2c8   : > { %1406 = vmatmul.bf16.gmra.mxu2 %v1290_v47  ;;  %1435 = vmatmul.bf16.gmra.mxu3 %v1290_v47 }
 0x2cb   : > { %v1206_v56 = vpop.f32.mrf.mxu0 }
 0x2cc   : > { %v1268_v60 = vadd.f32 %v1267_v52, %v1206_v56 }
 0x2ce   : > { %v1564_v9 = vpop.f32.mrf.mxu1 }
 0x2d3   : > { %v1208_v59 = vpop.f32.mrf.mxu0 }
 0x2d4   : > { %v1270_v61 = vadd.f32 %v1269_v53, %v1208_v59 }
 0x2d6   : > { %v1291_v62 = vpack.c.bf16 %v1270_v61, %v1268_v60  ;;  %v1566_v11 = vpop.f32.mrf.mxu1 }
 0x2d8   : > { %1411 = vmatmul.bf16.gmra.mxu2 %v1291_v62  ;;  %1440 = vmatmul.bf16.gmra.mxu3 %v1291_v62 }
 0x2db   : > { %v1535_v8 = vpop.f32.mrf.mxu0 }
 0x2de   : > { %v1569_v25 = vpop.f32.mrf.mxu1 }
 0x2e3   : > { %v1537_v10 = vpop.f32.mrf.mxu0 }
 0x2e6   : > { %v1571_v41 = vpop.f32.mrf.mxu1 }
 0x2eb   : > { %v1540_v24 = vpop.f32.mrf.mxu0 }
 0x2ee   : > { %v1574_v61 = vpop.f32.mrf.mxu1 }
 0x2f3   : > { %v1542_v40 = vpop.f32.mrf.mxu0 }
 0x2f6   : > { %v1576_v12 = vpop.f32.mrf.mxu1 }
 0x2fb   : > { %v1545_v60 = vpop.f32.mrf.mxu0 }
 0x32b   : > { %v1397_v15 = vpop.f32.mrf.mxu2  ;;  %v1426_v16 = vpop.f32.mrf.mxu3 }
 0x32c   : > { %v1536_v17 = vadd.f32 %v1535_v8, %v1397_v15  ;;  %v1565_v18 = vadd.f32 %v1564_v9, %v1426_v16  ;;  %v1630_v15 = vld [vmem:[%s3562_s16 + $0x40] sm:$0xff]  ;;  %v1631_v16 = vld [vmem:[%s3562_s16 + $0x48] sm:$0xff] }
 0x32e   : > { %v1590_v19 = vadd.f32 %v3421_v13, %v1536_v17  ;;  %v1591_v20 = vadd.f32 %v3423_v14, %v1565_v18 }
 0x330   : > { %v1606_v22 = vmax.f32 %v1590_v19, 0.0  ;;  %v1607_v23 = vmax.f32 %v1591_v20, 0.0 }
 0x332   : > { %v1638_v29 = vmul.f32 %v1622_v26, %v1606_v22  ;;  %v1639_v27 = vmul.f32 %v1623_v21, %v1607_v23 }
 0x333   : > { %v1399_v28 = vpop.f32.mrf.mxu2  ;;  %v1428_v30 = vpop.f32.mrf.mxu3 }
 0x334   : > { %v1538_v39 = vadd.f32 %v1537_v10, %v1399_v28  ;;  %v1567_v31 = vadd.f32 %v1566_v11, %v1428_v30  ;;  %1718 = vmatmul.f32.vlgmr.msra.gmra.mxu2 %v1638_v29  ;;  %1759 = vmatmul.f32.vlgmr.msra.gmra.mxu3 %v1639_v27  ;;  %v1547_v11 = vpop.f32.mrf.mxu0  ;;  %v1632_v29 = vld [vmem:[%s3562_s16 + $0x50] sm:$0xff]  ;;  %v1633_v27 = vld [vmem:[%s3562_s16 + $0x58] sm:$0xff] }
 0x336   : > { %v1592_v32 = vadd.f32 %v3421_v13, %v1538_v39  ;;  %v1593_v33 = vadd.f32 %v3423_v14, %v1567_v31  ;;  %v1579_v31 = vpop.f32.mrf.mxu1 }
 0x338   : > { %v1608_v36 = vmax.f32 %v1592_v32, 0.0  ;;  %v1609_v37 = vmax.f32 %v1593_v33, 0.0 }
 0x33a   : > { %v1640_v38 = vmul.f32 %v1624_v34, %v1608_v36  ;;  %v1641_v42 = vmul.f32 %v1625_v35, %v1609_v37 }
 0x33b   : > { %v1402_v43 = vpop.f32.mrf.mxu2  ;;  %v1431_v44 = vpop.f32.mrf.mxu3 }
 0x33c   : > { %v1541_v45 = vadd.f32 %v1540_v24, %v1402_v43  ;;  %v1570_v46 = vadd.f32 %v1569_v25, %v1431_v44  ;;  %1721 = vmatmul.f32.gmra.mxu2 %v1640_v38  ;;  %1762 = vmatmul.f32.gmra.mxu3 %v1641_v42  ;;  %v1550_v39 = vpop.f32.mrf.mxu0 }
 0x33e   : > { %v1594_v47 = vadd.f32 %v3421_v13, %v1541_v45  ;;  %v1595_v48 = vadd.f32 %v3423_v14, %v1570_v46  ;;  %v1581_v46 = vpop.f32.mrf.mxu1 }
 0x340   : > { %v1610_v51 = vmax.f32 %v1594_v47, 0.0  ;;  %v1611_v52 = vmax.f32 %v1595_v48, 0.0 }
 0x342   : > { %v1642_v54 = vmul.f32 %v1626_v49, %v1610_v51  ;;  %v1643_v55 = vmul.f32 %v1627_v50, %v1611_v52 }
 0x343   : > { %v1404_v56 = vpop.f32.mrf.mxu2  ;;  %v1433_v57 = vpop.f32.mrf.mxu3 }
 0x344   : > { %v1543_v59 = vadd.f32 %v1542_v40, %v1404_v56  ;;  %v1572_v53 = vadd.f32 %v1571_v41, %v1433_v57  ;;  %1724 = vmatmul.f32.gmra.mxu2 %v1642_v54  ;;  %1765 = vmatmul.f32.gmra.mxu3 %v1643_v55  ;;  %v1634_v40 = vld [vmem:[%s3562_s16 + $0x60] sm:$0xff]  ;;  %v1635_v41 = vld [vmem:[%s3562_s16 + $0x68] sm:$0xff]  ;;  %v1552_v45 = vpop.f32.mrf.mxu0  ;;  %v1636_v56 = vld [vmem:[%s3562_s16 + $0x70] sm:$0xff] }
 0x345   : > { %v1637_v57 = vld [vmem:[%s3562_s16 + $0x78] sm:$0xff] }
 0x346   : > { %v1596_v62 = vadd.f32 %v3421_v13, %v1543_v59  ;;  %v1597_v58 = vadd.f32 %v3423_v14, %v1572_v53 }
 0x348   : > { %v1612_v1 = vmax.f32 %v1596_v62, 0.0  ;;  %v1613_v2 = vmax.f32 %v1597_v58, 0.0  ;;  %v1654_v62 = vld [vmem:[#allocation8] sm:$0xff]  ;;  %v2584_v58 = vld [vmem:[#allocation2 + $0x30] sm:$0xff] }
 0x34a   : > { %v1644_v3 = vmul.f32 %v1628_v63, %v1612_v1  ;;  %v1645_v4 = vmul.f32 %v1629_v0, %v1613_v2  ;;  %v1662_v63 = vmul.f32 %v2584_v58, %v1654_v62  ;;  %v1655_v2 = vld [vmem:[#allocation8 + $0x8] sm:$0xff] }
 0x34b   : > { %v1407_v5 = vpop.f32.mrf.mxu2  ;;  %v1436_v6 = vpop.f32.mrf.mxu3 }
 0x34c   : > { %v1546_v7 = vadd.f32 %v1545_v60, %v1407_v5  ;;  %v1575_v8 = vadd.f32 %v1574_v61, %v1436_v6  ;;  %1727 = vmatmul.f32.gmra.mxu2 %v1644_v3  ;;  %1768 = vmatmul.f32.gmra.mxu3 %v1645_v4  ;;  %v2585_v3 = vld [vmem:[#allocation2] sm:$0xff] }
 0x34d   : > { %v1663_v4 = vmul.f32 %v2585_v3, %v1655_v2 }
 0x34e   : > { %v1598_v9 = vadd.f32 %v3421_v13, %v1546_v7  ;;  %v1599_v10 = vadd.f32 %v3423_v14, %v1575_v8 }
 0x350   : > { %v1614_v17 = vmax.f32 %v1598_v9, 0.0  ;;  %v1615_v18 = vmax.f32 %v1599_v10, 0.0  ;;  %v1656_v9 = vld [vmem:[#allocation8 + $0x10] sm:$0xff]  ;;  %v2586_v10 = vld [vmem:[#allocation2 + $0x18] sm:$0xff] }
 0x352   : > { %v1646_v19 = vmul.f32 %v1630_v15, %v1614_v17  ;;  %v1647_v20 = vmul.f32 %v1631_v16, %v1615_v18  ;;  %v1657_v18 = vld [vmem:[#allocation8 + $0x18] sm:$0xff] }
 0x353   : > { %v1409_v26 = vpop.f32.mrf.mxu2  ;;  %v1438_v21 = vpop.f32.mrf.mxu3 }
 0x354   : > { %v1548_v22 = vadd.f32 %v1547_v11, %v1409_v26  ;;  %v1577_v23 = vadd.f32 %v1576_v12, %v1438_v21  ;;  %1730 = vmatmul.f32.gmra.mxu2 %v1646_v19  ;;  %1771 = vmatmul.f32.gmra.mxu3 %v1647_v20  ;;  %v1664_v11 = vmul.f32 %v2586_v10, %v1656_v9  ;;  %v2587_v19 = vld [vmem:[#allocation2 + $0x10] sm:$0xff] }
 0x355   : > { %v1665_v20 = vmul.f32 %v2587_v19, %v1657_v18 }
 0x356   : > { %v1600_v24 = vadd.f32 %v3421_v13, %v1548_v22  ;;  %v1601_v25 = vadd.f32 %v3423_v14, %v1577_v23 }
 0x358   : > { %v1616_v28 = vmax.f32 %v1600_v24, 0.0  ;;  %v1617_v30 = vmax.f32 %v1601_v25, 0.0  ;;  %v1658_v24 = vld [vmem:[#allocation8 + $0x20] sm:$0xff]  ;;  %v2588_v25 = vld [vmem:[#allocation2 + $0x8] sm:$0xff] }
 0x35a   : > { %v1648_v32 = vmul.f32 %v1632_v29, %v1616_v28  ;;  %v1649_v33 = vmul.f32 %v1633_v27, %v1617_v30  ;;  %v1666_v29 = vmul.f32 %v2588_v25, %v1658_v24 }
 0x35b   : > { %v1412_v34 = vpop.f32.mrf.mxu2  ;;  %v1441_v35 = vpop.f32.mrf.mxu3 }
 0x35c   : > { %v1551_v36 = vadd.f32 %v1550_v39, %v1412_v34  ;;  %v1580_v37 = vadd.f32 %v1579_v31, %v1441_v35  ;;  %1733 = vmatmul.f32.gmra.mxu2 %v1648_v32  ;;  %1774 = vmatmul.f32.gmra.mxu3 %v1649_v33  ;;  %v1659_v31 = vld [vmem:[#allocation8 + $0x28] sm:$0xff]  ;;  %v2589_v32 = vld [vmem:[#allocation2 + $0x20] sm:$0xff] }
 0x35d   : > { %v1667_v33 = vmul.f32 %v2589_v32, %v1659_v31 }
 0x35e   : > { %v1602_v38 = vadd.f32 %v3421_v13, %v1551_v36  ;;  %v1603_v42 = vadd.f32 %v3423_v14, %v1580_v37 }
 0x360   : > { %v1618_v43 = vmax.f32 %v1602_v38, 0.0  ;;  %v1619_v44 = vmax.f32 %v1603_v42, 0.0  ;;  %v1660_v38 = vld [vmem:[#allocation8 + $0x30] sm:$0xff]  ;;  %v2590_v42 = vld [vmem:[#allocation2 + $0x28] sm:$0xff] }
 0x362   : > { %v1650_v47 = vmul.f32 %v1634_v40, %v1618_v43  ;;  %v1651_v48 = vmul.f32 %v1635_v41, %v1619_v44  ;;  %v1668_v40 = vmul.f32 %v2590_v42, %v1660_v38 }
 0x363   : > { %v1414_v49 = vpop.f32.mrf.mxu2  ;;  %v1443_v50 = vpop.f32.mrf.mxu3 }
 0x364   : > { %v1553_v51 = vadd.f32 %v1552_v45, %v1414_v49  ;;  %v1582_v52 = vadd.f32 %v1581_v46, %v1443_v50  ;;  %1736 = vmatmul.f32.gmra.mxu2 %v1650_v47  ;;  %1777 = vmatmul.f32.gmra.mxu3 %v1651_v48  ;;  %v1661_v46 = vld [vmem:[#allocation8 + $0x38] sm:$0xff] }
 0x365   : > { %v2591_v47 = vld [vmem:[#allocation2 + $0x38] sm:$0xff] }
 0x366   : > { %v1604_v54 = vadd.f32 %v3421_v13, %v1553_v51  ;;  %v1605_v55 = vadd.f32 %v3423_v14, %v1582_v52  ;;  %v1669_v48 = vmul.f32 %v2591_v47, %v1661_v46 }
 0x368   : > { %v1620_v59 = vmax.f32 %v1604_v54, 0.0  ;;  %v1621_v53 = vmax.f32 %v1605_v55, 0.0 }
 0x36a   : > { %v1652_v60 = vmul.f32 %v1636_v56, %v1620_v59  ;;  %v1653_v61 = vmul.f32 %v1637_v57, %v1621_v53 }
 0x36c   : > { %1739 = vmatmul.f32.gmra.mxu2 %v1652_v60  ;;  %1780 = vmatmul.f32.gmra.mxu3 %v1653_v61 }
 0x3b7   : > { %v1719_v13 = vpop.f32.mrf.mxu2  ;;  %v1760_v0 = vpop.f32.mrf.mxu3 }
 0x3b8   : > { %v1761_v14 = vadd.f32 %v1760_v0, %v1719_v13 }
 0x3ba   : > { %v1784_v1 = vadd.f32 %v1761_v14, %v1662_v63 }
 0x3bf   : > { %v1722_v5 = vpop.f32.mrf.mxu2  ;;  %v1763_v6 = vpop.f32.mrf.mxu3 }
 0x3c0   : > { %v1764_v7 = vadd.f32 %v1763_v6, %v1722_v5 }
 0x3c2   : > { %v1785_v8 = vadd.f32 %v1764_v7, %v1663_v4 }
 0x3c7   : > { %v1725_v12 = vpop.f32.mrf.mxu2  ;;  %v1766_v15 = vpop.f32.mrf.mxu3 }
 0x3c8   : > { %v1767_v16 = vadd.f32 %v1766_v15, %v1725_v12 }
 0x3ca   : > { %v1786_v17 = vadd.f32 %v1767_v16, %v1664_v11 }
 0x3cf   : > { %v1728_v26 = vpop.f32.mrf.mxu2  ;;  %v1769_v21 = vpop.f32.mrf.mxu3 }
 0x3d0   : > { %v1770_v22 = vadd.f32 %v1769_v21, %v1728_v26 }
 0x3d2   : > { %v1787_v23 = vadd.f32 %v1770_v22, %v1665_v20 }
 0x3d7   : > { %v1731_v27 = vpop.f32.mrf.mxu2  ;;  %v1772_v28 = vpop.f32.mrf.mxu3 }
 0x3d8   : > { %v1773_v30 = vadd.f32 %v1772_v28, %v1731_v27 }
 0x3da   : > { %v1788_v39 = vadd.f32 %v1773_v30, %v1666_v29 }
 0x3df   : > { %v1734_v34 = vpop.f32.mrf.mxu2  ;;  %v1775_v35 = vpop.f32.mrf.mxu3 }
 0x3e0   : > { %v1776_v36 = vadd.f32 %v1775_v35, %v1734_v34 }
 0x3e2   : > { %v1789_v37 = vadd.f32 %v1776_v36, %v1667_v33 }
 0x3e7   : > { %v1737_v41 = vpop.f32.mrf.mxu2  ;;  %v1778_v43 = vpop.f32.mrf.mxu3 }
 0x3e8   : > { %v1779_v44 = vadd.f32 %v1778_v43, %v1737_v41 }
 0x3ea   : > { %v1790_v45 = vadd.f32 %v1779_v44, %v1668_v40 }
 0x3ee   : > { %1795 = sbr.rel (%p2383_p8) target bundleno = 1019 (0x3fb), region = 112 }
 0x3ef   : > { %v1740_v49 = vpop.f32.mrf.mxu2  ;;  %v1781_v50 = vpop.f32.mrf.mxu3 }
 0x3f0   : > { %v1782_v51 = vadd.f32 %v1781_v50, %v1740_v49 }
 0x3f2   : > { %v1791_v52 = vadd.f32 %v1782_v51, %v1669_v48 }
 0x3f3   : > { %1796 = vst [vmem:[#allocation2 + $0x30] sm:$0xff] %v1784_v1 }
 0x3f4   : > { %1797 = vst [vmem:[#allocation2] sm:$0xff] %v1785_v8 }
 0x3f5   : > { %1798 = vst [vmem:[#allocation2 + $0x18] sm:$0xff] %v1786_v17 }
 0x3f6   : > { %1799 = vst [vmem:[#allocation2 + $0x10] sm:$0xff] %v1787_v23 }
 0x3f7   : > { %1800 = vst [vmem:[#allocation2 + $0x8] sm:$0xff] %v1788_v39 }
 0x3f8   : > { %1801 = vst [vmem:[#allocation2 + $0x20] sm:$0xff] %v1789_v37 }
 0x3f9   : > { %1802 = vst [vmem:[#allocation2 + $0x28] sm:$0xff] %v1790_v45 }
 0x3fa   : > { %1803 = vst [vmem:[#allocation2 + $0x38] sm:$0xff] %v1791_v52 }
 0x3fb PF: > { %p2384_p9 = scmp.ne.s32.totalorder %s3039_s25, 1 }
 0x3fd   : > { %1807 = sbr.rel (%p2384_p9) target bundleno = 1034 (0x40a), region = 116 }
 0x402   : > { %1808 = vst [vmem:[#allocation16] sm:$0xff] %v1784_v1 }
 0x403   : > { %1809 = vst [vmem:[#allocation16 + $0x8] sm:$0xff] %v1785_v8 }
 0x404   : > { %1810 = vst [vmem:[#allocation16 + $0x10] sm:$0xff] %v1786_v17 }
 0x405   : > { %1811 = vst [vmem:[#allocation16 + $0x18] sm:$0xff] %v1787_v23 }
 0x406   : > { %1812 = vst [vmem:[#allocation16 + $0x20] sm:$0xff] %v1788_v39 }
 0x407   : > { %1813 = vst [vmem:[#allocation16 + $0x28] sm:$0xff] %v1789_v37 }
 0x408   : > { %1814 = vst [vmem:[#allocation16 + $0x30] sm:$0xff] %v1790_v45 }
 0x409   : > { %1815 = vst [vmem:[#allocation16 + $0x38] sm:$0xff] %v1791_v52 }
 0x40a PF: > { %p2533_p10 = scmp.eq.s32.totalorder %s3039_s25, 1  ;;  %s2952_s5 = smov [#allocation16]  }
 0x40b   : > { %s1821_s6 = sshll.u32 %s2952_s5, 4  ;;  %s3563_s13 = sld [smem:[#allocation32_spill]]  ;;  %s1822_s6 = int_to_ptr.vmem [resolvable:$true] %s1821_s6 }
 0x40c   : > { %s2953_s11 = smov 128   ;;  %s2954_s24 = smov 8  }
 0x411   : > { %s1823_s26 = sshll.u32 %s3563_s13, 4  ;;  %s1824_s26 = int_to_ptr.hbm [resolvable:$true] %s1823_s26 }
 0x412   : > { %2492 = dma.vmem_to_hbm [thread:$0]  (%p2533_p10), %s1822_s6, 1024, %s1824_s26, [#allocation5], %s2953_s11, %s2953_s11, %s2954_s24  }
 0x413   : > { %2923 = dma.done.wait (%p2533_p10), [#allocation5], 1024  }
 0x414   : > { %2925 = vsyncadd (%p2533_p10), [#allocation5], 4294966272 }
 0x415 PF: > { %s3564_s24 = sld [smem:[#allocation23_spill]]  ;;  %s3567_s22 = smov %s2936_s23 }
 0x416   : > { %s3565_s21 = sld [smem:[#allocation22_spill]] }
 0x417   : > { %s3566_s18 = sld [smem:[#allocation24_spill]] }
 0x41b   : > { %p23_p0 = scmp.ge.s32.totalorder %s3564_s24, 4  }
 0x41d   : > { %s3568_s23 = smov %s3566_s18  ;;  %25 = sbr.rel (!%p23_p0) target bundleno = 13 (0xd), region = 187 }
 0x422   :  { %1840 = vsyncpa [#allocation4], 1 }
 0x423   :  { %1842 = vsyncpa [#allocation4 + $0x1], 1 }
 0x424   :  { %1843 = vsyncpa [#allocation7], 1 }
 0x425   :  { %1844 = vsyncpa [#allocation10], 1 }
 0x426   :  { %1845 = vsyncpa [#allocation5], 1 }
 0x427   :  { %1847 = vsyncpa [#allocation5 + $0x1], 1 }

</bundles_post_ra>
